<compile_context>
chip_gen: v5e
topology: v5e:2x2
jax: 0.10.0
libtpu: 0.0.40
codegen_flags: <defaults>
</compile_context>

<pallas_src>
import functools
import math

import jax
import jax.numpy as jnp
from jax.experimental import pallas as pl
from jax.experimental.pallas import tpu as pltpu

HIDDEN = 16
HEADS = 2
HEAD_DIM = HIDDEN // HEADS          # 8
INTER = 64
NUM_LAYERS = 3
LN_EPS = 1e-12

# ---- packed-parameter slab layout (per layer), width P_COLS ----------------
ROW_WQKV = 0                         # (H, 3H)    rows [0, 16)
ROW_WO = HIDDEN                      # (H, H)     rows [16, 32)
ROW_WI = 2 * HIDDEN                  # (H, INTER) rows [32, 48)
ROW_W2 = 3 * HIDDEN                  # (INTER, H) rows [48, 112)
ROW_VEC = 3 * HIDDEN + INTER         # 112 (multiple of 8 -> aligned (8,128) tile)
P_ROWS = ROW_VEC + 8                 # 120
P_COLS = 128                         # lane-aligned slab

# vector-row order inside the (8, P_COLS) tail tile
V_BQKV, V_BO, V_G1, V_BE1, V_BI, V_B2, V_G2, V_BE2 = range(8)


def _erf(x):
    # Abramowitz & Stegun 7.1.26 rational approximation (|err| < 1.5e-7).
    # Divide replaced by pl.reciprocal per review; exact mode keeps parity.
    # TODO(synk): switch to jax.lax.erf once its Mosaic lowering is guaranteed.
    a1, a2, a3, a4, a5 = 0.254829592, -0.284496736, 1.421413741, -1.453152027, 1.061405429
    p = 0.3275911
    s = jnp.where(x < 0.0, -1.0, 1.0)
    ax = jnp.abs(x)
    t = pl.reciprocal(1.0 + p * ax, approx=False)
    poly = ((((a5 * t + a4) * t + a3) * t + a2) * t + a1) * t
    return s * (1.0 - poly * jnp.exp(-ax * ax))


def _gelu_exact(x):
    # torch.nn.functional.gelu default (erf-based, non-approximate)
    return 0.5 * x * (1.0 + _erf(x * (1.0 / math.sqrt(2.0))))


def _layernorm(x, gamma, beta):
    mean = jnp.mean(x, axis=-1, keepdims=True)
    var = jnp.mean((x - mean) ** 2, axis=-1, keepdims=True)
    inv = jax.lax.rsqrt(var + LN_EPS)
    return (x - mean) * inv * gamma + beta


def bert_encoder_kernel(x_ref, p_ref, o_ref, *, num_layers):
    # One grid step == one sequence: x is (S, H); attention never crosses
    # sequences, so no mask is needed at all.
    x = x_ref[0]                                                 # (S, H) f32

    for l in range(num_layers):                                  # static unroll
        # ---- weights: static ref slices (free), all starting at lane 0 ----
        wqkv = p_ref[l, ROW_WQKV:ROW_WQKV + HIDDEN, 0:3 * HIDDEN]   # scale folded
        wo = p_ref[l, ROW_WO:ROW_WO + HIDDEN, 0:HIDDEN]
        wi = p_ref[l, ROW_WI:ROW_WI + HIDDEN, 0:INTER]
        w2 = p_ref[l, ROW_W2:ROW_W2 + INTER, 0:HIDDEN]
        # ---- all bias / gamma / beta rows: one aligned (8, 128) tile ----
        vecs = p_ref[l, ROW_VEC:ROW_VEC + 8, :]
        bqkv = vecs[V_BQKV:V_BQKV + 1, 0:3 * HIDDEN]
        bo = vecs[V_BO:V_BO + 1, 0:HIDDEN]
        g1 = vecs[V_G1:V_G1 + 1, 0:HIDDEN]
        be1 = vecs[V_BE1:V_BE1 + 1, 0:HIDDEN]
        bi = vecs[V_BI:V_BI + 1, 0:INTER]
        b2 = vecs[V_B2:V_B2 + 1, 0:HIDDEN]
        g2 = vecs[V_G2:V_G2 + 1, 0:HIDDEN]
        be2 = vecs[V_BE2:V_BE2 + 1, 0:HIDDEN]

        # --- BertSelfAttention: fused Q|K|V projection (one matmul) ---
        qkv = jnp.dot(x, wqkv, preferred_element_type=jnp.float32) + bqkv  # (S, 3H)

        ctx_heads = []
        for h in range(HEADS):                                   # static, 2 heads
            lo = h * HEAD_DIM
            qh = qkv[:, lo:lo + HEAD_DIM]                        # (S, dh), pre-scaled
            kh = qkv[:, HIDDEN + lo:HIDDEN + lo + HEAD_DIM]
            vh = qkv[:, 2 * HIDDEN + lo:2 * HIDDEN + lo + HEAD_DIM]
            # contraction over dh without explicit transpose -> (S, S) scores
            s = jax.lax.dot_general(qh, kh, (((1,), (1,)), ((), ())),
                                    preferred_element_type=jnp.float32)
            m = jnp.max(s, axis=-1, keepdims=True)
            e = jnp.exp(s - m)
            inv = pl.reciprocal(jnp.sum(e, axis=-1, keepdims=True), approx=False)
            probs = e * inv                                      # softmax(dim=-1)
            # attention dropout is identity in eval mode
            ctx_heads.append(jnp.dot(probs, vh, preferred_element_type=jnp.float32))
        # permute(0,2,1,3).view(..., all_head_size) == concat heads on last dim
        ctx = jnp.concatenate(ctx_heads, axis=-1)                # (S, H)

        # --- BertSelfOutput: dense + residual + LayerNorm ---
        attn = jnp.dot(ctx, wo, preferred_element_type=jnp.float32) + bo
        y = _layernorm(attn + x, g1, be1)

        # --- BertIntermediate: dense + exact (erf) GELU ---
        ff = _gelu_exact(jnp.dot(y, wi, preferred_element_type=jnp.float32) + bi)

        # --- BertOutput: dense + residual + LayerNorm ---
        out = jnp.dot(ff, w2, preferred_element_type=jnp.float32) + b2
        x = _layernorm(out + y, g2, be2)

    o_ref[0] = x


def bert_encoder(hidden, packed_params):
    """hidden: (B, S, H) f32; packed_params: (L, P_ROWS, P_COLS) f32."""
    B, S, H = hidden.shape
    L = packed_params.shape[0]

    kernel = functools.partial(bert_encoder_kernel, num_layers=L)
    return pl.pallas_call(
        kernel,
        out_shape=jax.ShapeDtypeStruct((B, S, H), jnp.float32),
        grid=(B,),                                               # one sequence per step
        in_specs=[pl.BlockSpec((1, S, H), lambda b: (b, 0, 0)),
                  pl.BlockSpec((L, P_ROWS, P_COLS), lambda b: (0, 0, 0))],
        out_specs=pl.BlockSpec((1, S, H), lambda b: (b, 0, 0)),
        compiler_params=pltpu.CompilerParams(
            dimension_semantics=("parallel",)),                  # megacore on v7x
    )(hidden, packed_params)


# ------------------------- host-side param handling -------------------------

def init_layer_params(key):
    ks = jax.random.split(key, 12)
    return {
        "wq": jax.random.normal(ks[0], (HIDDEN, HIDDEN), jnp.float32) * 0.05,
        "bq": jax.random.normal(ks[1], (1, HIDDEN), jnp.float32) * 0.02,
        "wk": jax.random.normal(ks[2], (HIDDEN, HIDDEN), jnp.float32) * 0.05,
        "bk": jax.random.normal(ks[3], (1, HIDDEN), jnp.float32) * 0.02,
        "wv": jax.random.normal(ks[4], (HIDDEN, HIDDEN), jnp.float32) * 0.05,
        "bv": jax.random.normal(ks[5], (1, HIDDEN), jnp.float32) * 0.02,
        "wo": jax.random.normal(ks[6], (HIDDEN, HIDDEN), jnp.float32) * 0.05,
        "bo": jax.random.normal(ks[7], (1, HIDDEN), jnp.float32) * 0.02,
        "g1": jnp.ones((1, HIDDEN), jnp.float32),
        "be1": jnp.zeros((1, HIDDEN), jnp.float32),
        "wi": jax.random.normal(ks[8], (HIDDEN, INTER), jnp.float32) * 0.05,
        "bi": jax.random.normal(ks[9], (1, INTER), jnp.float32) * 0.02,
        "w2": jax.random.normal(ks[10], (INTER, HIDDEN), jnp.float32) * 0.05,
        "b2": jax.random.normal(ks[11], (1, HIDDEN), jnp.float32) * 0.02,
        "g2": jnp.ones((1, HIDDEN), jnp.float32),
        "be2": jnp.zeros((1, HIDDEN), jnp.float32),
    }


def init_params(key, num_layers=NUM_LAYERS):
    return [init_layer_params(k) for k in jax.random.split(key, num_layers)]


def pack_params(layer_params):
    """Pack per-layer params into one (L, P_ROWS, P_COLS=128) lane-aligned slab.
    Folds the 1/sqrt(head_dim) attention scale into Wq / bq."""
    scale = 1.0 / math.sqrt(HEAD_DIM)
    slabs = []
    for p in layer_params:
        wqkv = jnp.concatenate([p["wq"] * scale, p["wk"], p["wv"]], axis=1)  # (H, 3H)
        bqkv = jnp.concatenate([p["bq"] * scale, p["bk"], p["bv"]], axis=1)  # (1, 3H)
        slab = jnp.zeros((P_ROWS, P_COLS), jnp.float32)
        slab = slab.at[ROW_WQKV:ROW_WQKV + HIDDEN, 0:3 * HIDDEN].set(wqkv)
        slab = slab.at[ROW_WO:ROW_WO + HIDDEN, 0:HIDDEN].set(p["wo"])
        slab = slab.at[ROW_WI:ROW_WI + HIDDEN, 0:INTER].set(p["wi"])
        slab = slab.at[ROW_W2:ROW_W2 + INTER, 0:HIDDEN].set(p["w2"])
        slab = slab.at[ROW_VEC + V_BQKV, 0:3 * HIDDEN].set(bqkv[0])
        slab = slab.at[ROW_VEC + V_BO, 0:HIDDEN].set(p["bo"][0])
        slab = slab.at[ROW_VEC + V_G1, 0:HIDDEN].set(p["g1"][0])
        slab = slab.at[ROW_VEC + V_BE1, 0:HIDDEN].set(p["be1"][0])
        slab = slab.at[ROW_VEC + V_BI, 0:INTER].set(p["bi"][0])
        slab = slab.at[ROW_VEC + V_B2, 0:HIDDEN].set(p["b2"][0])
        slab = slab.at[ROW_VEC + V_G2, 0:HIDDEN].set(p["g2"][0])
        slab = slab.at[ROW_VEC + V_BE2, 0:HIDDEN].set(p["be2"][0])
        slabs.append(slab)
    return jnp.stack(slabs, axis=0)


# ------------------------------ pure-JAX reference ---------------------------

def bert_encoder_ref(hidden, layer_params):
    """Pure-JAX reference of BertEncoder.forward (eval mode, no masks)."""
    B, S, H = hidden.shape

    def ln(x, g, b):
        mu = x.mean(-1, keepdims=True)
        var = ((x - mu) ** 2).mean(-1, keepdims=True)
        return (x - mu) / jnp.sqrt(var + LN_EPS) * g + b

    def split(t):  # (B,S,H) -> (B,heads,S,dh)
        return t.reshape(B, S, HEADS, HEAD_DIM).transpose(0, 2, 1, 3)

    x = hidden
    for p in layer_params:
        q = x @ p["wq"] + p["bq"]
        k = x @ p["wk"] + p["bk"]
        v = x @ p["wv"] + p["bv"]
        qh, kh, vh = split(q), split(k), split(v)
        scores = jnp.einsum("bhqd,bhkd->bhqk", qh, kh) / math.sqrt(HEAD_DIM)
        probs = jax.nn.softmax(scores, axis=-1)
        ctx = jnp.einsum("bhqk,bhkd->bhqd", probs, vh)
        ctx = ctx.transpose(0, 2, 1, 3).reshape(B, S, H)
        attn = ctx @ p["wo"] + p["bo"]
        y = ln(attn + x, p["g1"], p["be1"])
        ff = y @ p["wi"] + p["bi"]
        ff = 0.5 * ff * (1.0 + jax.scipy.special.erf(ff / math.sqrt(2.0)))
        out = ff @ p["w2"] + p["b2"]
        x = ln(out + y, p["g2"], p["be2"])
    return x


if __name__ == "__main__":
    key = jax.random.PRNGKey(0)
    k_x, k_p = jax.random.split(key)
    B, S = 2, 8
    hidden = jax.random.normal(k_x, (B, S, HIDDEN), jnp.float32)
    layer_params = init_params(k_p, NUM_LAYERS)
    packed = pack_params(layer_params)

    out = bert_encoder(hidden, packed)
    out = jax.block_until_ready(out)

    ref = bert_encoder_ref(hidden, layer_params)
    assert out.shape == (B, S, HIDDEN)
    max_err = float(jnp.max(jnp.abs(out - ref)))
    assert jnp.allclose(out, ref, atol=5e-5, rtol=5e-5), max_err
    print("KERNEL_OK")
</pallas_src>

<mosaic_0001>
module attributes {stable_mosaic.version = 11 : i64} {
  func.func @bert_encoder_kernel(%arg0: i32, %arg1: memref<1x8x16xf32, #tpu.memory_space<vmem>>, %arg2: memref<3x120x128xf32, #tpu.memory_space<vmem>>, %arg3: memref<1x8x16xf32, #tpu.memory_space<vmem>>) attributes {dimension_semantics = [#tpu.dimension_semantics<parallel>], iteration_bounds = array<i64: 2>, scalar_prefetch = 0 : i64, scratch_operands = 0 : i64, tpu.core_type = #tpu.core_type<tc>, window_params = [{transform_indices = @transform_0, window_bounds = array<i64: 1, 8, 16>}, {pipeline_mode = #tpu.pipeline_mode<synchronous>, transform_indices = @transform_1, window_bounds = array<i64: 3, 120, 128>}, {transform_indices = @transform_2, window_bounds = array<i64: 1, 8, 16>}]} {
    %c0 = arith.constant 0 : index
    %c0_0 = arith.constant 0 : index
    %c0_1 = arith.constant 0 : index
    %0 = vector.load %arg1[%c0, %c0_0, %c0_1] : memref<1x8x16xf32, #tpu.memory_space<vmem>>, vector<1x8x16xf32>
    %1 = vector.shape_cast %0 : vector<1x8x16xf32> to vector<8x16xf32>
    %c0_2 = arith.constant 0 : index
    %c0_3 = arith.constant 0 : index
    %c0_4 = arith.constant 0 : index
    %2 = vector.load %arg2[%c0_2, %c0_3, %c0_4] : memref<3x120x128xf32, #tpu.memory_space<vmem>>, vector<1x16x48xf32>
    %3 = vector.shape_cast %2 : vector<1x16x48xf32> to vector<16x48xf32>
    %c0_5 = arith.constant 0 : index
    %c16 = arith.constant 16 : index
    %c0_6 = arith.constant 0 : index
    %4 = vector.load %arg2[%c0_5, %c16, %c0_6] : memref<3x120x128xf32, #tpu.memory_space<vmem>>, vector<1x16x16xf32>
    %5 = vector.shape_cast %4 : vector<1x16x16xf32> to vector<16x16xf32>
    %c0_7 = arith.constant 0 : index
    %c32 = arith.constant 32 : index
    %c0_8 = arith.constant 0 : index
    %6 = vector.load %arg2[%c0_7, %c32, %c0_8] : memref<3x120x128xf32, #tpu.memory_space<vmem>>, vector<1x16x64xf32>
    %7 = vector.shape_cast %6 : vector<1x16x64xf32> to vector<16x64xf32>
    %c0_9 = arith.constant 0 : index
    %c48 = arith.constant 48 : index
    %c0_10 = arith.constant 0 : index
    %8 = vector.load %arg2[%c0_9, %c48, %c0_10] : memref<3x120x128xf32, #tpu.memory_space<vmem>>, vector<1x64x16xf32>
    %9 = vector.shape_cast %8 : vector<1x64x16xf32> to vector<64x16xf32>
    %c0_11 = arith.constant 0 : index
    %c112 = arith.constant 112 : index
    %c0_12 = arith.constant 0 : index
    %10 = vector.load %arg2[%c0_11, %c112, %c0_12] : memref<3x120x128xf32, #tpu.memory_space<vmem>>, vector<1x8x128xf32>
    %11 = vector.shape_cast %10 : vector<1x8x128xf32> to vector<8x128xf32>
    %12 = vector.extract_strided_slice %11 {offsets = [0, 0], sizes = [1, 48], strides = [1, 1]} : vector<8x128xf32> to vector<1x48xf32>
    %13 = vector.extract_strided_slice %11 {offsets = [1, 0], sizes = [1, 16], strides = [1, 1]} : vector<8x128xf32> to vector<1x16xf32>
    %14 = vector.extract_strided_slice %11 {offsets = [2, 0], sizes = [1, 16], strides = [1, 1]} : vector<8x128xf32> to vector<1x16xf32>
    %15 = vector.extract_strided_slice %11 {offsets = [3, 0], sizes = [1, 16], strides = [1, 1]} : vector<8x128xf32> to vector<1x16xf32>
    %16 = vector.extract_strided_slice %11 {offsets = [4, 0], sizes = [1, 64], strides = [1, 1]} : vector<8x128xf32> to vector<1x64xf32>
    %17 = vector.extract_strided_slice %11 {offsets = [5, 0], sizes = [1, 16], strides = [1, 1]} : vector<8x128xf32> to vector<1x16xf32>
    %18 = vector.extract_strided_slice %11 {offsets = [6, 0], sizes = [1, 16], strides = [1, 1]} : vector<8x128xf32> to vector<1x16xf32>
    %19 = vector.extract_strided_slice %11 {offsets = [7, 0], sizes = [1, 16], strides = [1, 1]} : vector<8x128xf32> to vector<1x16xf32>
    %cst = arith.constant dense<0.000000e+00> : vector<8x48xf32>
    %20 = tpu.matmul %1, %3, %cst {dimension_numbers = #tpu.dot_dimension_numbers<[1], [0], [0], [1], [0, 0, 1, 1], [], []>} : vector<8x16xf32>, vector<16x48xf32>, vector<8x48xf32> -> vector<8x48xf32>
    %21 = vector.broadcast %12 : vector<1x48xf32> to vector<8x48xf32>
    %22 = arith.addf %20, %21 : vector<8x48xf32>
    %23 = vector.extract_strided_slice %22 {offsets = [0, 0], sizes = [8, 8], strides = [1, 1]} : vector<8x48xf32> to vector<8x8xf32>
    %24 = vector.extract_strided_slice %22 {offsets = [0, 16], sizes = [8, 8], strides = [1, 1]} : vector<8x48xf32> to vector<8x8xf32>
    %25 = vector.extract_strided_slice %22 {offsets = [0, 32], sizes = [8, 8], strides = [1, 1]} : vector<8x48xf32> to vector<8x8xf32>
    %cst_13 = arith.constant dense<0.000000e+00> : vector<8x8xf32>
    %26 = tpu.matmul %23, %24, %cst_13 {dimension_numbers = #tpu.dot_dimension_numbers<[1], [1], [0], [0], [0, 0, 1, 0], [], []>} : vector<8x8xf32>, vector<8x8xf32>, vector<8x8xf32> -> vector<8x8xf32>
    %cst_14 = arith.constant dense<0xFF800000> : vector<8xf32>
    %27 = vector.multi_reduction <maximumf>, %26, %cst_14 [1] : vector<8x8xf32> to vector<8xf32>
    %28 = vector.shape_cast %27 : vector<8xf32> to vector<8x1xf32>
    %29 = vector.broadcast %28 : vector<8x1xf32> to vector<8x8xf32>
    %30 = arith.subf %26, %29 : vector<8x8xf32>
    %31 = math.exp %30 : vector<8x8xf32>
    %cst_15 = arith.constant dense<0.000000e+00> : vector<8xf32>
    %32 = vector.multi_reduction <add>, %31, %cst_15 [1] : vector<8x8xf32> to vector<8xf32>
    %33 = vector.shape_cast %32 : vector<8xf32> to vector<8x1xf32>
    %34 = tpu.reciprocal %33 : vector<8x1xf32> -> vector<8x1xf32>
    %35 = vector.broadcast %34 : vector<8x1xf32> to vector<8x8xf32>
    %36 = arith.mulf %31, %35 : vector<8x8xf32>
    %cst_16 = arith.constant dense<0.000000e+00> : vector<8x8xf32>
    %37 = tpu.matmul %36, %25, %cst_16 {dimension_numbers = #tpu.dot_dimension_numbers<[1], [0], [0], [1], [0, 0, 1, 1], [], []>} : vector<8x8xf32>, vector<8x8xf32>, vector<8x8xf32> -> vector<8x8xf32>
    %38 = vector.extract_strided_slice %22 {offsets = [0, 8], sizes = [8, 8], strides = [1, 1]} : vector<8x48xf32> to vector<8x8xf32>
    %39 = vector.extract_strided_slice %22 {offsets = [0, 24], sizes = [8, 8], strides = [1, 1]} : vector<8x48xf32> to vector<8x8xf32>
    %40 = vector.extract_strided_slice %22 {offsets = [0, 40], sizes = [8, 8], strides = [1, 1]} : vector<8x48xf32> to vector<8x8xf32>
    %cst_17 = arith.constant dense<0.000000e+00> : vector<8x8xf32>
    %41 = tpu.matmul %38, %39, %cst_17 {dimension_numbers = #tpu.dot_dimension_numbers<[1], [1], [0], [0], [0, 0, 1, 0], [], []>} : vector<8x8xf32>, vector<8x8xf32>, vector<8x8xf32> -> vector<8x8xf32>
    %cst_18 = arith.constant dense<0xFF800000> : vector<8xf32>
    %42 = vector.multi_reduction <maximumf>, %41, %cst_18 [1] : vector<8x8xf32> to vector<8xf32>
    %43 = vector.shape_cast %42 : vector<8xf32> to vector<8x1xf32>
    %44 = vector.broadcast %43 : vector<8x1xf32> to vector<8x8xf32>
    %45 = arith.subf %41, %44 : vector<8x8xf32>
    %46 = math.exp %45 : vector<8x8xf32>
    %cst_19 = arith.constant dense<0.000000e+00> : vector<8xf32>
    %47 = vector.multi_reduction <add>, %46, %cst_19 [1] : vector<8x8xf32> to vector<8xf32>
    %48 = vector.shape_cast %47 : vector<8xf32> to vector<8x1xf32>
    %49 = tpu.reciprocal %48 : vector<8x1xf32> -> vector<8x1xf32>
    %50 = vector.broadcast %49 : vector<8x1xf32> to vector<8x8xf32>
    %51 = arith.mulf %46, %50 : vector<8x8xf32>
    %cst_20 = arith.constant dense<0.000000e+00> : vector<8x8xf32>
    %52 = tpu.matmul %51, %40, %cst_20 {dimension_numbers = #tpu.dot_dimension_numbers<[1], [0], [0], [1], [0, 0, 1, 1], [], []>} : vector<8x8xf32>, vector<8x8xf32>, vector<8x8xf32> -> vector<8x8xf32>
    %53 = tpu.concatenate %37, %52 in 1 : vector<8x8xf32>, vector<8x8xf32> -> vector<8x16xf32>
    %cst_21 = arith.constant dense<0.000000e+00> : vector<8x16xf32>
    %54 = tpu.matmul %53, %5, %cst_21 {dimension_numbers = #tpu.dot_dimension_numbers<[1], [0], [0], [1], [0, 0, 1, 1], [], []>} : vector<8x16xf32>, vector<16x16xf32>, vector<8x16xf32> -> vector<8x16xf32>
    %55 = vector.broadcast %13 : vector<1x16xf32> to vector<8x16xf32>
    %56 = arith.addf %54, %55 : vector<8x16xf32>
    %57 = arith.addf %56, %1 : vector<8x16xf32>
    %cst_22 = arith.constant dense<0.000000e+00> : vector<8xf32>
    %58 = vector.multi_reduction <add>, %57, %cst_22 [1] : vector<8x16xf32> to vector<8xf32>
    %59 = vector.shape_cast %58 : vector<8xf32> to vector<8x1xf32>
    %cst_23 = arith.constant 1.600000e+01 : f32
    %60 = vector.broadcast %cst_23 : f32 to vector<8x1xf32>
    %61 = arith.divf %59, %60 : vector<8x1xf32>
    %62 = vector.broadcast %61 : vector<8x1xf32> to vector<8x16xf32>
    %63 = arith.subf %57, %62 : vector<8x16xf32>
    %64 = arith.mulf %63, %63 : vector<8x16xf32>
    %cst_24 = arith.constant dense<0.000000e+00> : vector<8xf32>
    %65 = vector.multi_reduction <add>, %64, %cst_24 [1] : vector<8x16xf32> to vector<8xf32>
    %66 = vector.shape_cast %65 : vector<8xf32> to vector<8x1xf32>
    %cst_25 = arith.constant 1.600000e+01 : f32
    %67 = vector.broadcast %cst_25 : f32 to vector<8x1xf32>
    %68 = arith.divf %66, %67 : vector<8x1xf32>
    %cst_26 = arith.constant 9.99999996E-13 : f32
    %69 = vector.broadcast %cst_26 : f32 to vector<8x1xf32>
    %70 = arith.addf %68, %69 : vector<8x1xf32>
    %71 = math.rsqrt %70 : vector<8x1xf32>
    %72 = vector.broadcast %61 : vector<8x1xf32> to vector<8x16xf32>
    %73 = arith.subf %57, %72 : vector<8x16xf32>
    %74 = vector.broadcast %71 : vector<8x1xf32> to vector<8x16xf32>
    %75 = arith.mulf %73, %74 : vector<8x16xf32>
    %76 = vector.broadcast %14 : vector<1x16xf32> to vector<8x16xf32>
    %77 = arith.mulf %75, %76 : vector<8x16xf32>
    %78 = vector.broadcast %15 : vector<1x16xf32> to vector<8x16xf32>
    %79 = arith.addf %77, %78 : vector<8x16xf32>
    %cst_27 = arith.constant dense<0.000000e+00> : vector<8x64xf32>
    %80 = tpu.matmul %79, %7, %cst_27 {dimension_numbers = #tpu.dot_dimension_numbers<[1], [0], [0], [1], [0, 0, 1, 1], [], []>} : vector<8x16xf32>, vector<16x64xf32>, vector<8x64xf32> -> vector<8x64xf32>
    %81 = vector.broadcast %16 : vector<1x64xf32> to vector<8x64xf32>
    %82 = arith.addf %80, %81 : vector<8x64xf32>
    %cst_28 = arith.constant 5.000000e-01 : f32
    %83 = vector.broadcast %cst_28 : f32 to vector<8x64xf32>
    %84 = arith.mulf %83, %82 : vector<8x64xf32>
    %cst_29 = arith.constant 0.707106769 : f32
    %85 = vector.broadcast %cst_29 : f32 to vector<8x64xf32>
    %86 = arith.mulf %82, %85 : vector<8x64xf32>
    %cst_30 = arith.constant 0.000000e+00 : f32
    %87 = vector.broadcast %cst_30 : f32 to vector<8x64xf32>
    %88 = arith.cmpf olt, %86, %87 : vector<8x64xf32>
    %cst_31 = arith.constant -1.000000e+00 : f32
    %cst_32 = arith.constant 1.000000e+00 : f32
    %89 = vector.broadcast %cst_31 : f32 to vector<8x64xf32>
    %90 = vector.broadcast %cst_32 : f32 to vector<8x64xf32>
    %91 = arith.select %88, %89, %90 : vector<8x64xi1>, vector<8x64xf32>
    %92 = math.absf %86 : vector<8x64xf32>
    %cst_33 = arith.constant 0.327591091 : f32
    %93 = vector.broadcast %cst_33 : f32 to vector<8x64xf32>
    %94 = arith.mulf %93, %92 : vector<8x64xf32>
    %cst_34 = arith.constant 1.000000e+00 : f32
    %95 = vector.broadcast %cst_34 : f32 to vector<8x64xf32>
    %96 = arith.addf %95, %94 : vector<8x64xf32>
    %97 = tpu.reciprocal %96 : vector<8x64xf32> -> vector<8x64xf32>
    %cst_35 = arith.constant 1.06140542 : f32
    %98 = vector.broadcast %cst_35 : f32 to vector<8x64xf32>
    %99 = arith.mulf %98, %97 : vector<8x64xf32>
    %cst_36 = arith.constant -1.45315206 : f32
    %100 = vector.broadcast %cst_36 : f32 to vector<8x64xf32>
    %101 = arith.addf %99, %100 : vector<8x64xf32>
    %102 = arith.mulf %101, %97 : vector<8x64xf32>
    %cst_37 = arith.constant 1.42141378 : f32
    %103 = vector.broadcast %cst_37 : f32 to vector<8x64xf32>
    %104 = arith.addf %102, %103 : vector<8x64xf32>
    %105 = arith.mulf %104, %97 : vector<8x64xf32>
    %cst_38 = arith.constant -0.284496725 : f32
    %106 = vector.broadcast %cst_38 : f32 to vector<8x64xf32>
    %107 = arith.addf %105, %106 : vector<8x64xf32>
    %108 = arith.mulf %107, %97 : vector<8x64xf32>
    %cst_39 = arith.constant 0.254829586 : f32
    %109 = vector.broadcast %cst_39 : f32 to vector<8x64xf32>
    %110 = arith.addf %108, %109 : vector<8x64xf32>
    %111 = arith.mulf %110, %97 : vector<8x64xf32>
    %cst_40 = arith.constant 0.000000e+00 : f32
    %112 = vector.broadcast %cst_40 : f32 to vector<8x64xf32>
    %113 = arith.subf %112, %92 : vector<8x64xf32>
    %114 = arith.mulf %113, %92 : vector<8x64xf32>
    %115 = math.exp %114 : vector<8x64xf32>
    %116 = arith.mulf %111, %115 : vector<8x64xf32>
    %cst_41 = arith.constant 1.000000e+00 : f32
    %117 = vector.broadcast %cst_41 : f32 to vector<8x64xf32>
    %118 = arith.subf %117, %116 : vector<8x64xf32>
    %119 = arith.mulf %91, %118 : vector<8x64xf32>
    %cst_42 = arith.constant 1.000000e+00 : f32
    %120 = vector.broadcast %cst_42 : f32 to vector<8x64xf32>
    %121 = arith.addf %120, %119 : vector<8x64xf32>
    %122 = arith.mulf %84, %121 : vector<8x64xf32>
    %cst_43 = arith.constant dense<0.000000e+00> : vector<8x16xf32>
    %123 = tpu.matmul %122, %9, %cst_43 {dimension_numbers = #tpu.dot_dimension_numbers<[1], [0], [0], [1], [0, 0, 1, 1], [], []>} : vector<8x64xf32>, vector<64x16xf32>, vector<8x16xf32> -> vector<8x16xf32>
    %124 = vector.broadcast %17 : vector<1x16xf32> to vector<8x16xf32>
    %125 = arith.addf %123, %124 : vector<8x16xf32>
    %126 = arith.addf %125, %79 : vector<8x16xf32>
    %cst_44 = arith.constant dense<0.000000e+00> : vector<8xf32>
    %127 = vector.multi_reduction <add>, %126, %cst_44 [1] : vector<8x16xf32> to vector<8xf32>
    %128 = vector.shape_cast %127 : vector<8xf32> to vector<8x1xf32>
    %cst_45 = arith.constant 1.600000e+01 : f32
    %129 = vector.broadcast %cst_45 : f32 to vector<8x1xf32>
    %130 = arith.divf %128, %129 : vector<8x1xf32>
    %131 = vector.broadcast %130 : vector<8x1xf32> to vector<8x16xf32>
    %132 = arith.subf %126, %131 : vector<8x16xf32>
    %133 = arith.mulf %132, %132 : vector<8x16xf32>
    %cst_46 = arith.constant dense<0.000000e+00> : vector<8xf32>
    %134 = vector.multi_reduction <add>, %133, %cst_46 [1] : vector<8x16xf32> to vector<8xf32>
    %135 = vector.shape_cast %134 : vector<8xf32> to vector<8x1xf32>
    %cst_47 = arith.constant 1.600000e+01 : f32
    %136 = vector.broadcast %cst_47 : f32 to vector<8x1xf32>
    %137 = arith.divf %135, %136 : vector<8x1xf32>
    %cst_48 = arith.constant 9.99999996E-13 : f32
    %138 = vector.broadcast %cst_48 : f32 to vector<8x1xf32>
    %139 = arith.addf %137, %138 : vector<8x1xf32>
    %140 = math.rsqrt %139 : vector<8x1xf32>
    %141 = vector.broadcast %130 : vector<8x1xf32> to vector<8x16xf32>
    %142 = arith.subf %126, %141 : vector<8x16xf32>
    %143 = vector.broadcast %140 : vector<8x1xf32> to vector<8x16xf32>
    %144 = arith.mulf %142, %143 : vector<8x16xf32>
    %145 = vector.broadcast %18 : vector<1x16xf32> to vector<8x16xf32>
    %146 = arith.mulf %144, %145 : vector<8x16xf32>
    %147 = vector.broadcast %19 : vector<1x16xf32> to vector<8x16xf32>
    %148 = arith.addf %146, %147 : vector<8x16xf32>
    %c1 = arith.constant 1 : index
    %c0_49 = arith.constant 0 : index
    %c0_50 = arith.constant 0 : index
    %149 = vector.load %arg2[%c1, %c0_49, %c0_50] : memref<3x120x128xf32, #tpu.memory_space<vmem>>, vector<1x16x48xf32>
    %150 = vector.shape_cast %149 : vector<1x16x48xf32> to vector<16x48xf32>
    %c1_51 = arith.constant 1 : index
    %c16_52 = arith.constant 16 : index
    %c0_53 = arith.constant 0 : index
    %151 = vector.load %arg2[%c1_51, %c16_52, %c0_53] : memref<3x120x128xf32, #tpu.memory_space<vmem>>, vector<1x16x16xf32>
    %152 = vector.shape_cast %151 : vector<1x16x16xf32> to vector<16x16xf32>
    %c1_54 = arith.constant 1 : index
    %c32_55 = arith.constant 32 : index
    %c0_56 = arith.constant 0 : index
    %153 = vector.load %arg2[%c1_54, %c32_55, %c0_56] : memref<3x120x128xf32, #tpu.memory_space<vmem>>, vector<1x16x64xf32>
    %154 = vector.shape_cast %153 : vector<1x16x64xf32> to vector<16x64xf32>
    %c1_57 = arith.constant 1 : index
    %c48_58 = arith.constant 48 : index
    %c0_59 = arith.constant 0 : index
    %155 = vector.load %arg2[%c1_57, %c48_58, %c0_59] : memref<3x120x128xf32, #tpu.memory_space<vmem>>, vector<1x64x16xf32>
    %156 = vector.shape_cast %155 : vector<1x64x16xf32> to vector<64x16xf32>
    %c1_60 = arith.constant 1 : index
    %c112_61 = arith.constant 112 : index
    %c0_62 = arith.constant 0 : index
    %157 = vector.load %arg2[%c1_60, %c112_61, %c0_62] : memref<3x120x128xf32, #tpu.memory_space<vmem>>, vector<1x8x128xf32>
    %158 = vector.shape_cast %157 : vector<1x8x128xf32> to vector<8x128xf32>
    %159 = vector.extract_strided_slice %158 {offsets = [0, 0], sizes = [1, 48], strides = [1, 1]} : vector<8x128xf32> to vector<1x48xf32>
    %160 = vector.extract_strided_slice %158 {offsets = [1, 0], sizes = [1, 16], strides = [1, 1]} : vector<8x128xf32> to vector<1x16xf32>
    %161 = vector.extract_strided_slice %158 {offsets = [2, 0], sizes = [1, 16], strides = [1, 1]} : vector<8x128xf32> to vector<1x16xf32>
    %162 = vector.extract_strided_slice %158 {offsets = [3, 0], sizes = [1, 16], strides = [1, 1]} : vector<8x128xf32> to vector<1x16xf32>
    %163 = vector.extract_strided_slice %158 {offsets = [4, 0], sizes = [1, 64], strides = [1, 1]} : vector<8x128xf32> to vector<1x64xf32>
    %164 = vector.extract_strided_slice %158 {offsets = [5, 0], sizes = [1, 16], strides = [1, 1]} : vector<8x128xf32> to vector<1x16xf32>
    %165 = vector.extract_strided_slice %158 {offsets = [6, 0], sizes = [1, 16], strides = [1, 1]} : vector<8x128xf32> to vector<1x16xf32>
    %166 = vector.extract_strided_slice %158 {offsets = [7, 0], sizes = [1, 16], strides = [1, 1]} : vector<8x128xf32> to vector<1x16xf32>
    %cst_63 = arith.constant dense<0.000000e+00> : vector<8x48xf32>
    %167 = tpu.matmul %148, %150, %cst_63 {dimension_numbers = #tpu.dot_dimension_numbers<[1], [0], [0], [1], [0, 0, 1, 1], [], []>} : vector<8x16xf32>, vector<16x48xf32>, vector<8x48xf32> -> vector<8x48xf32>
    %168 = vector.broadcast %159 : vector<1x48xf32> to vector<8x48xf32>
    %169 = arith.addf %167, %168 : vector<8x48xf32>
    %170 = vector.extract_strided_slice %169 {offsets = [0, 0], sizes = [8, 8], strides = [1, 1]} : vector<8x48xf32> to vector<8x8xf32>
    %171 = vector.extract_strided_slice %169 {offsets = [0, 16], sizes = [8, 8], strides = [1, 1]} : vector<8x48xf32> to vector<8x8xf32>
    %172 = vector.extract_strided_slice %169 {offsets = [0, 32], sizes = [8, 8], strides = [1, 1]} : vector<8x48xf32> to vector<8x8xf32>
    %cst_64 = arith.constant dense<0.000000e+00> : vector<8x8xf32>
    %173 = tpu.matmul %170, %171, %cst_64 {dimension_numbers = #tpu.dot_dimension_numbers<[1], [1], [0], [0], [0, 0, 1, 0], [], []>} : vector<8x8xf32>, vector<8x8xf32>, vector<8x8xf32> -> vector<8x8xf32>
    %cst_65 = arith.constant dense<0xFF800000> : vector<8xf32>
    %174 = vector.multi_reduction <maximumf>, %173, %cst_65 [1] : vector<8x8xf32> to vector<8xf32>
    %175 = vector.shape_cast %174 : vector<8xf32> to vector<8x1xf32>
    %176 = vector.broadcast %175 : vector<8x1xf32> to vector<8x8xf32>
    %177 = arith.subf %173, %176 : vector<8x8xf32>
    %178 = math.exp %177 : vector<8x8xf32>
    %cst_66 = arith.constant dense<0.000000e+00> : vector<8xf32>
    %179 = vector.multi_reduction <add>, %178, %cst_66 [1] : vector<8x8xf32> to vector<8xf32>
    %180 = vector.shape_cast %179 : vector<8xf32> to vector<8x1xf32>
    %181 = tpu.reciprocal %180 : vector<8x1xf32> -> vector<8x1xf32>
    %182 = vector.broadcast %181 : vector<8x1xf32> to vector<8x8xf32>
    %183 = arith.mulf %178, %182 : vector<8x8xf32>
    %cst_67 = arith.constant dense<0.000000e+00> : vector<8x8xf32>
    %184 = tpu.matmul %183, %172, %cst_67 {dimension_numbers = #tpu.dot_dimension_numbers<[1], [0], [0], [1], [0, 0, 1, 1], [], []>} : vector<8x8xf32>, vector<8x8xf32>, vector<8x8xf32> -> vector<8x8xf32>
    %185 = vector.extract_strided_slice %169 {offsets = [0, 8], sizes = [8, 8], strides = [1, 1]} : vector<8x48xf32> to vector<8x8xf32>
    %186 = vector.extract_strided_slice %169 {offsets = [0, 24], sizes = [8, 8], strides = [1, 1]} : vector<8x48xf32> to vector<8x8xf32>
    %187 = vector.extract_strided_slice %169 {offsets = [0, 40], sizes = [8, 8], strides = [1, 1]} : vector<8x48xf32> to vector<8x8xf32>
    %cst_68 = arith.constant dense<0.000000e+00> : vector<8x8xf32>
    %188 = tpu.matmul %185, %186, %cst_68 {dimension_numbers = #tpu.dot_dimension_numbers<[1], [1], [0], [0], [0, 0, 1, 0], [], []>} : vector<8x8xf32>, vector<8x8xf32>, vector<8x8xf32> -> vector<8x8xf32>
    %cst_69 = arith.constant dense<0xFF800000> : vector<8xf32>
    %189 = vector.multi_reduction <maximumf>, %188, %cst_69 [1] : vector<8x8xf32> to vector<8xf32>
    %190 = vector.shape_cast %189 : vector<8xf32> to vector<8x1xf32>
    %191 = vector.broadcast %190 : vector<8x1xf32> to vector<8x8xf32>
    %192 = arith.subf %188, %191 : vector<8x8xf32>
    %193 = math.exp %192 : vector<8x8xf32>
    %cst_70 = arith.constant dense<0.000000e+00> : vector<8xf32>
    %194 = vector.multi_reduction <add>, %193, %cst_70 [1] : vector<8x8xf32> to vector<8xf32>
    %195 = vector.shape_cast %194 : vector<8xf32> to vector<8x1xf32>
    %196 = tpu.reciprocal %195 : vector<8x1xf32> -> vector<8x1xf32>
    %197 = vector.broadcast %196 : vector<8x1xf32> to vector<8x8xf32>
    %198 = arith.mulf %193, %197 : vector<8x8xf32>
    %cst_71 = arith.constant dense<0.000000e+00> : vector<8x8xf32>
    %199 = tpu.matmul %198, %187, %cst_71 {dimension_numbers = #tpu.dot_dimension_numbers<[1], [0], [0], [1], [0, 0, 1, 1], [], []>} : vector<8x8xf32>, vector<8x8xf32>, vector<8x8xf32> -> vector<8x8xf32>
    %200 = tpu.concatenate %184, %199 in 1 : vector<8x8xf32>, vector<8x8xf32> -> vector<8x16xf32>
    %cst_72 = arith.constant dense<0.000000e+00> : vector<8x16xf32>
    %201 = tpu.matmul %200, %152, %cst_72 {dimension_numbers = #tpu.dot_dimension_numbers<[1], [0], [0], [1], [0, 0, 1, 1], [], []>} : vector<8x16xf32>, vector<16x16xf32>, vector<8x16xf32> -> vector<8x16xf32>
    %202 = vector.broadcast %160 : vector<1x16xf32> to vector<8x16xf32>
    %203 = arith.addf %201, %202 : vector<8x16xf32>
    %204 = arith.addf %203, %148 : vector<8x16xf32>
    %cst_73 = arith.constant dense<0.000000e+00> : vector<8xf32>
    %205 = vector.multi_reduction <add>, %204, %cst_73 [1] : vector<8x16xf32> to vector<8xf32>
    %206 = vector.shape_cast %205 : vector<8xf32> to vector<8x1xf32>
    %cst_74 = arith.constant 1.600000e+01 : f32
    %207 = vector.broadcast %cst_74 : f32 to vector<8x1xf32>
    %208 = arith.divf %206, %207 : vector<8x1xf32>
    %209 = vector.broadcast %208 : vector<8x1xf32> to vector<8x16xf32>
    %210 = arith.subf %204, %209 : vector<8x16xf32>
    %211 = arith.mulf %210, %210 : vector<8x16xf32>
    %cst_75 = arith.constant dense<0.000000e+00> : vector<8xf32>
    %212 = vector.multi_reduction <add>, %211, %cst_75 [1] : vector<8x16xf32> to vector<8xf32>
    %213 = vector.shape_cast %212 : vector<8xf32> to vector<8x1xf32>
    %cst_76 = arith.constant 1.600000e+01 : f32
    %214 = vector.broadcast %cst_76 : f32 to vector<8x1xf32>
    %215 = arith.divf %213, %214 : vector<8x1xf32>
    %cst_77 = arith.constant 9.99999996E-13 : f32
    %216 = vector.broadcast %cst_77 : f32 to vector<8x1xf32>
    %217 = arith.addf %215, %216 : vector<8x1xf32>
    %218 = math.rsqrt %217 : vector<8x1xf32>
    %219 = vector.broadcast %208 : vector<8x1xf32> to vector<8x16xf32>
    %220 = arith.subf %204, %219 : vector<8x16xf32>
    %221 = vector.broadcast %218 : vector<8x1xf32> to vector<8x16xf32>
    %222 = arith.mulf %220, %221 : vector<8x16xf32>
    %223 = vector.broadcast %161 : vector<1x16xf32> to vector<8x16xf32>
    %224 = arith.mulf %222, %223 : vector<8x16xf32>
    %225 = vector.broadcast %162 : vector<1x16xf32> to vector<8x16xf32>
    %226 = arith.addf %224, %225 : vector<8x16xf32>
    %cst_78 = arith.constant dense<0.000000e+00> : vector<8x64xf32>
    %227 = tpu.matmul %226, %154, %cst_78 {dimension_numbers = #tpu.dot_dimension_numbers<[1], [0], [0], [1], [0, 0, 1, 1], [], []>} : vector<8x16xf32>, vector<16x64xf32>, vector<8x64xf32> -> vector<8x64xf32>
    %228 = vector.broadcast %163 : vector<1x64xf32> to vector<8x64xf32>
    %229 = arith.addf %227, %228 : vector<8x64xf32>
    %cst_79 = arith.constant 5.000000e-01 : f32
    %230 = vector.broadcast %cst_79 : f32 to vector<8x64xf32>
    %231 = arith.mulf %230, %229 : vector<8x64xf32>
    %cst_80 = arith.constant 0.707106769 : f32
    %232 = vector.broadcast %cst_80 : f32 to vector<8x64xf32>
    %233 = arith.mulf %229, %232 : vector<8x64xf32>
    %cst_81 = arith.constant 0.000000e+00 : f32
    %234 = vector.broadcast %cst_81 : f32 to vector<8x64xf32>
    %235 = arith.cmpf olt, %233, %234 : vector<8x64xf32>
    %cst_82 = arith.constant -1.000000e+00 : f32
    %cst_83 = arith.constant 1.000000e+00 : f32
    %236 = vector.broadcast %cst_82 : f32 to vector<8x64xf32>
    %237 = vector.broadcast %cst_83 : f32 to vector<8x64xf32>
    %238 = arith.select %235, %236, %237 : vector<8x64xi1>, vector<8x64xf32>
    %239 = math.absf %233 : vector<8x64xf32>
    %cst_84 = arith.constant 0.327591091 : f32
    %240 = vector.broadcast %cst_84 : f32 to vector<8x64xf32>
    %241 = arith.mulf %240, %239 : vector<8x64xf32>
    %cst_85 = arith.constant 1.000000e+00 : f32
    %242 = vector.broadcast %cst_85 : f32 to vector<8x64xf32>
    %243 = arith.addf %242, %241 : vector<8x64xf32>
    %244 = tpu.reciprocal %243 : vector<8x64xf32> -> vector<8x64xf32>
    %cst_86 = arith.constant 1.06140542 : f32
    %245 = vector.broadcast %cst_86 : f32 to vector<8x64xf32>
    %246 = arith.mulf %245, %244 : vector<8x64xf32>
    %cst_87 = arith.constant -1.45315206 : f32
    %247 = vector.broadcast %cst_87 : f32 to vector<8x64xf32>
    %248 = arith.addf %246, %247 : vector<8x64xf32>
    %249 = arith.mulf %248, %244 : vector<8x64xf32>
    %cst_88 = arith.constant 1.42141378 : f32
    %250 = vector.broadcast %cst_88 : f32 to vector<8x64xf32>
    %251 = arith.addf %249, %250 : vector<8x64xf32>
    %252 = arith.mulf %251, %244 : vector<8x64xf32>
    %cst_89 = arith.constant -0.284496725 : f32
    %253 = vector.broadcast %cst_89 : f32 to vector<8x64xf32>
    %254 = arith.addf %252, %253 : vector<8x64xf32>
    %255 = arith.mulf %254, %244 : vector<8x64xf32>
    %cst_90 = arith.constant 0.254829586 : f32
    %256 = vector.broadcast %cst_90 : f32 to vector<8x64xf32>
    %257 = arith.addf %255, %256 : vector<8x64xf32>
    %258 = arith.mulf %257, %244 : vector<8x64xf32>
    %cst_91 = arith.constant 0.000000e+00 : f32
    %259 = vector.broadcast %cst_91 : f32 to vector<8x64xf32>
    %260 = arith.subf %259, %239 : vector<8x64xf32>
    %261 = arith.mulf %260, %239 : vector<8x64xf32>
    %262 = math.exp %261 : vector<8x64xf32>
    %263 = arith.mulf %258, %262 : vector<8x64xf32>
    %cst_92 = arith.constant 1.000000e+00 : f32
    %264 = vector.broadcast %cst_92 : f32 to vector<8x64xf32>
    %265 = arith.subf %264, %263 : vector<8x64xf32>
    %266 = arith.mulf %238, %265 : vector<8x64xf32>
    %cst_93 = arith.constant 1.000000e+00 : f32
    %267 = vector.broadcast %cst_93 : f32 to vector<8x64xf32>
    %268 = arith.addf %267, %266 : vector<8x64xf32>
    %269 = arith.mulf %231, %268 : vector<8x64xf32>
    %cst_94 = arith.constant dense<0.000000e+00> : vector<8x16xf32>
    %270 = tpu.matmul %269, %156, %cst_94 {dimension_numbers = #tpu.dot_dimension_numbers<[1], [0], [0], [1], [0, 0, 1, 1], [], []>} : vector<8x64xf32>, vector<64x16xf32>, vector<8x16xf32> -> vector<8x16xf32>
    %271 = vector.broadcast %164 : vector<1x16xf32> to vector<8x16xf32>
    %272 = arith.addf %270, %271 : vector<8x16xf32>
    %273 = arith.addf %272, %226 : vector<8x16xf32>
    %cst_95 = arith.constant dense<0.000000e+00> : vector<8xf32>
    %274 = vector.multi_reduction <add>, %273, %cst_95 [1] : vector<8x16xf32> to vector<8xf32>
    %275 = vector.shape_cast %274 : vector<8xf32> to vector<8x1xf32>
    %cst_96 = arith.constant 1.600000e+01 : f32
    %276 = vector.broadcast %cst_96 : f32 to vector<8x1xf32>
    %277 = arith.divf %275, %276 : vector<8x1xf32>
    %278 = vector.broadcast %277 : vector<8x1xf32> to vector<8x16xf32>
    %279 = arith.subf %273, %278 : vector<8x16xf32>
    %280 = arith.mulf %279, %279 : vector<8x16xf32>
    %cst_97 = arith.constant dense<0.000000e+00> : vector<8xf32>
    %281 = vector.multi_reduction <add>, %280, %cst_97 [1] : vector<8x16xf32> to vector<8xf32>
    %282 = vector.shape_cast %281 : vector<8xf32> to vector<8x1xf32>
    %cst_98 = arith.constant 1.600000e+01 : f32
    %283 = vector.broadcast %cst_98 : f32 to vector<8x1xf32>
    %284 = arith.divf %282, %283 : vector<8x1xf32>
    %cst_99 = arith.constant 9.99999996E-13 : f32
    %285 = vector.broadcast %cst_99 : f32 to vector<8x1xf32>
    %286 = arith.addf %284, %285 : vector<8x1xf32>
    %287 = math.rsqrt %286 : vector<8x1xf32>
    %288 = vector.broadcast %277 : vector<8x1xf32> to vector<8x16xf32>
    %289 = arith.subf %273, %288 : vector<8x16xf32>
    %290 = vector.broadcast %287 : vector<8x1xf32> to vector<8x16xf32>
    %291 = arith.mulf %289, %290 : vector<8x16xf32>
    %292 = vector.broadcast %165 : vector<1x16xf32> to vector<8x16xf32>
    %293 = arith.mulf %291, %292 : vector<8x16xf32>
    %294 = vector.broadcast %166 : vector<1x16xf32> to vector<8x16xf32>
    %295 = arith.addf %293, %294 : vector<8x16xf32>
    %c2 = arith.constant 2 : index
    %c0_100 = arith.constant 0 : index
    %c0_101 = arith.constant 0 : index
    %296 = vector.load %arg2[%c2, %c0_100, %c0_101] : memref<3x120x128xf32, #tpu.memory_space<vmem>>, vector<1x16x48xf32>
    %297 = vector.shape_cast %296 : vector<1x16x48xf32> to vector<16x48xf32>
    %c2_102 = arith.constant 2 : index
    %c16_103 = arith.constant 16 : index
    %c0_104 = arith.constant 0 : index
    %298 = vector.load %arg2[%c2_102, %c16_103, %c0_104] : memref<3x120x128xf32, #tpu.memory_space<vmem>>, vector<1x16x16xf32>
    %299 = vector.shape_cast %298 : vector<1x16x16xf32> to vector<16x16xf32>
    %c2_105 = arith.constant 2 : index
    %c32_106 = arith.constant 32 : index
    %c0_107 = arith.constant 0 : index
    %300 = vector.load %arg2[%c2_105, %c32_106, %c0_107] : memref<3x120x128xf32, #tpu.memory_space<vmem>>, vector<1x16x64xf32>
    %301 = vector.shape_cast %300 : vector<1x16x64xf32> to vector<16x64xf32>
    %c2_108 = arith.constant 2 : index
    %c48_109 = arith.constant 48 : index
    %c0_110 = arith.constant 0 : index
    %302 = vector.load %arg2[%c2_108, %c48_109, %c0_110] : memref<3x120x128xf32, #tpu.memory_space<vmem>>, vector<1x64x16xf32>
    %303 = vector.shape_cast %302 : vector<1x64x16xf32> to vector<64x16xf32>
    %c2_111 = arith.constant 2 : index
    %c112_112 = arith.constant 112 : index
    %c0_113 = arith.constant 0 : index
    %304 = vector.load %arg2[%c2_111, %c112_112, %c0_113] : memref<3x120x128xf32, #tpu.memory_space<vmem>>, vector<1x8x128xf32>
    %305 = vector.shape_cast %304 : vector<1x8x128xf32> to vector<8x128xf32>
    %306 = vector.extract_strided_slice %305 {offsets = [0, 0], sizes = [1, 48], strides = [1, 1]} : vector<8x128xf32> to vector<1x48xf32>
    %307 = vector.extract_strided_slice %305 {offsets = [1, 0], sizes = [1, 16], strides = [1, 1]} : vector<8x128xf32> to vector<1x16xf32>
    %308 = vector.extract_strided_slice %305 {offsets = [2, 0], sizes = [1, 16], strides = [1, 1]} : vector<8x128xf32> to vector<1x16xf32>
    %309 = vector.extract_strided_slice %305 {offsets = [3, 0], sizes = [1, 16], strides = [1, 1]} : vector<8x128xf32> to vector<1x16xf32>
    %310 = vector.extract_strided_slice %305 {offsets = [4, 0], sizes = [1, 64], strides = [1, 1]} : vector<8x128xf32> to vector<1x64xf32>
    %311 = vector.extract_strided_slice %305 {offsets = [5, 0], sizes = [1, 16], strides = [1, 1]} : vector<8x128xf32> to vector<1x16xf32>
    %312 = vector.extract_strided_slice %305 {offsets = [6, 0], sizes = [1, 16], strides = [1, 1]} : vector<8x128xf32> to vector<1x16xf32>
    %313 = vector.extract_strided_slice %305 {offsets = [7, 0], sizes = [1, 16], strides = [1, 1]} : vector<8x128xf32> to vector<1x16xf32>
    %cst_114 = arith.constant dense<0.000000e+00> : vector<8x48xf32>
    %314 = tpu.matmul %295, %297, %cst_114 {dimension_numbers = #tpu.dot_dimension_numbers<[1], [0], [0], [1], [0, 0, 1, 1], [], []>} : vector<8x16xf32>, vector<16x48xf32>, vector<8x48xf32> -> vector<8x48xf32>
    %315 = vector.broadcast %306 : vector<1x48xf32> to vector<8x48xf32>
    %316 = arith.addf %314, %315 : vector<8x48xf32>
    %317 = vector.extract_strided_slice %316 {offsets = [0, 0], sizes = [8, 8], strides = [1, 1]} : vector<8x48xf32> to vector<8x8xf32>
    %318 = vector.extract_strided_slice %316 {offsets = [0, 16], sizes = [8, 8], strides = [1, 1]} : vector<8x48xf32> to vector<8x8xf32>
    %319 = vector.extract_strided_slice %316 {offsets = [0, 32], sizes = [8, 8], strides = [1, 1]} : vector<8x48xf32> to vector<8x8xf32>
    %cst_115 = arith.constant dense<0.000000e+00> : vector<8x8xf32>
    %320 = tpu.matmul %317, %318, %cst_115 {dimension_numbers = #tpu.dot_dimension_numbers<[1], [1], [0], [0], [0, 0, 1, 0], [], []>} : vector<8x8xf32>, vector<8x8xf32>, vector<8x8xf32> -> vector<8x8xf32>
    %cst_116 = arith.constant dense<0xFF800000> : vector<8xf32>
    %321 = vector.multi_reduction <maximumf>, %320, %cst_116 [1] : vector<8x8xf32> to vector<8xf32>
    %322 = vector.shape_cast %321 : vector<8xf32> to vector<8x1xf32>
    %323 = vector.broadcast %322 : vector<8x1xf32> to vector<8x8xf32>
    %324 = arith.subf %320, %323 : vector<8x8xf32>
    %325 = math.exp %324 : vector<8x8xf32>
    %cst_117 = arith.constant dense<0.000000e+00> : vector<8xf32>
    %326 = vector.multi_reduction <add>, %325, %cst_117 [1] : vector<8x8xf32> to vector<8xf32>
    %327 = vector.shape_cast %326 : vector<8xf32> to vector<8x1xf32>
    %328 = tpu.reciprocal %327 : vector<8x1xf32> -> vector<8x1xf32>
    %329 = vector.broadcast %328 : vector<8x1xf32> to vector<8x8xf32>
    %330 = arith.mulf %325, %329 : vector<8x8xf32>
    %cst_118 = arith.constant dense<0.000000e+00> : vector<8x8xf32>
    %331 = tpu.matmul %330, %319, %cst_118 {dimension_numbers = #tpu.dot_dimension_numbers<[1], [0], [0], [1], [0, 0, 1, 1], [], []>} : vector<8x8xf32>, vector<8x8xf32>, vector<8x8xf32> -> vector<8x8xf32>
    %332 = vector.extract_strided_slice %316 {offsets = [0, 8], sizes = [8, 8], strides = [1, 1]} : vector<8x48xf32> to vector<8x8xf32>
    %333 = vector.extract_strided_slice %316 {offsets = [0, 24], sizes = [8, 8], strides = [1, 1]} : vector<8x48xf32> to vector<8x8xf32>
    %334 = vector.extract_strided_slice %316 {offsets = [0, 40], sizes = [8, 8], strides = [1, 1]} : vector<8x48xf32> to vector<8x8xf32>
    %cst_119 = arith.constant dense<0.000000e+00> : vector<8x8xf32>
    %335 = tpu.matmul %332, %333, %cst_119 {dimension_numbers = #tpu.dot_dimension_numbers<[1], [1], [0], [0], [0, 0, 1, 0], [], []>} : vector<8x8xf32>, vector<8x8xf32>, vector<8x8xf32> -> vector<8x8xf32>
    %cst_120 = arith.constant dense<0xFF800000> : vector<8xf32>
    %336 = vector.multi_reduction <maximumf>, %335, %cst_120 [1] : vector<8x8xf32> to vector<8xf32>
    %337 = vector.shape_cast %336 : vector<8xf32> to vector<8x1xf32>
    %338 = vector.broadcast %337 : vector<8x1xf32> to vector<8x8xf32>
    %339 = arith.subf %335, %338 : vector<8x8xf32>
    %340 = math.exp %339 : vector<8x8xf32>
    %cst_121 = arith.constant dense<0.000000e+00> : vector<8xf32>
    %341 = vector.multi_reduction <add>, %340, %cst_121 [1] : vector<8x8xf32> to vector<8xf32>
    %342 = vector.shape_cast %341 : vector<8xf32> to vector<8x1xf32>
    %343 = tpu.reciprocal %342 : vector<8x1xf32> -> vector<8x1xf32>
    %344 = vector.broadcast %343 : vector<8x1xf32> to vector<8x8xf32>
    %345 = arith.mulf %340, %344 : vector<8x8xf32>
    %cst_122 = arith.constant dense<0.000000e+00> : vector<8x8xf32>
    %346 = tpu.matmul %345, %334, %cst_122 {dimension_numbers = #tpu.dot_dimension_numbers<[1], [0], [0], [1], [0, 0, 1, 1], [], []>} : vector<8x8xf32>, vector<8x8xf32>, vector<8x8xf32> -> vector<8x8xf32>
    %347 = tpu.concatenate %331, %346 in 1 : vector<8x8xf32>, vector<8x8xf32> -> vector<8x16xf32>
    %cst_123 = arith.constant dense<0.000000e+00> : vector<8x16xf32>
    %348 = tpu.matmul %347, %299, %cst_123 {dimension_numbers = #tpu.dot_dimension_numbers<[1], [0], [0], [1], [0, 0, 1, 1], [], []>} : vector<8x16xf32>, vector<16x16xf32>, vector<8x16xf32> -> vector<8x16xf32>
    %349 = vector.broadcast %307 : vector<1x16xf32> to vector<8x16xf32>
    %350 = arith.addf %348, %349 : vector<8x16xf32>
    %351 = arith.addf %350, %295 : vector<8x16xf32>
    %cst_124 = arith.constant dense<0.000000e+00> : vector<8xf32>
    %352 = vector.multi_reduction <add>, %351, %cst_124 [1] : vector<8x16xf32> to vector<8xf32>
    %353 = vector.shape_cast %352 : vector<8xf32> to vector<8x1xf32>
    %cst_125 = arith.constant 1.600000e+01 : f32
    %354 = vector.broadcast %cst_125 : f32 to vector<8x1xf32>
    %355 = arith.divf %353, %354 : vector<8x1xf32>
    %356 = vector.broadcast %355 : vector<8x1xf32> to vector<8x16xf32>
    %357 = arith.subf %351, %356 : vector<8x16xf32>
    %358 = arith.mulf %357, %357 : vector<8x16xf32>
    %cst_126 = arith.constant dense<0.000000e+00> : vector<8xf32>
    %359 = vector.multi_reduction <add>, %358, %cst_126 [1] : vector<8x16xf32> to vector<8xf32>
    %360 = vector.shape_cast %359 : vector<8xf32> to vector<8x1xf32>
    %cst_127 = arith.constant 1.600000e+01 : f32
    %361 = vector.broadcast %cst_127 : f32 to vector<8x1xf32>
    %362 = arith.divf %360, %361 : vector<8x1xf32>
    %cst_128 = arith.constant 9.99999996E-13 : f32
    %363 = vector.broadcast %cst_128 : f32 to vector<8x1xf32>
    %364 = arith.addf %362, %363 : vector<8x1xf32>
    %365 = math.rsqrt %364 : vector<8x1xf32>
    %366 = vector.broadcast %355 : vector<8x1xf32> to vector<8x16xf32>
    %367 = arith.subf %351, %366 : vector<8x16xf32>
    %368 = vector.broadcast %365 : vector<8x1xf32> to vector<8x16xf32>
    %369 = arith.mulf %367, %368 : vector<8x16xf32>
    %370 = vector.broadcast %308 : vector<1x16xf32> to vector<8x16xf32>
    %371 = arith.mulf %369, %370 : vector<8x16xf32>
    %372 = vector.broadcast %309 : vector<1x16xf32> to vector<8x16xf32>
    %373 = arith.addf %371, %372 : vector<8x16xf32>
    %cst_129 = arith.constant dense<0.000000e+00> : vector<8x64xf32>
    %374 = tpu.matmul %373, %301, %cst_129 {dimension_numbers = #tpu.dot_dimension_numbers<[1], [0], [0], [1], [0, 0, 1, 1], [], []>} : vector<8x16xf32>, vector<16x64xf32>, vector<8x64xf32> -> vector<8x64xf32>
    %375 = vector.broadcast %310 : vector<1x64xf32> to vector<8x64xf32>
    %376 = arith.addf %374, %375 : vector<8x64xf32>
    %cst_130 = arith.constant 5.000000e-01 : f32
    %377 = vector.broadcast %cst_130 : f32 to vector<8x64xf32>
    %378 = arith.mulf %377, %376 : vector<8x64xf32>
    %cst_131 = arith.constant 0.707106769 : f32
    %379 = vector.broadcast %cst_131 : f32 to vector<8x64xf32>
    %380 = arith.mulf %376, %379 : vector<8x64xf32>
    %cst_132 = arith.constant 0.000000e+00 : f32
    %381 = vector.broadcast %cst_132 : f32 to vector<8x64xf32>
    %382 = arith.cmpf olt, %380, %381 : vector<8x64xf32>
    %cst_133 = arith.constant -1.000000e+00 : f32
    %cst_134 = arith.constant 1.000000e+00 : f32
    %383 = vector.broadcast %cst_133 : f32 to vector<8x64xf32>
    %384 = vector.broadcast %cst_134 : f32 to vector<8x64xf32>
    %385 = arith.select %382, %383, %384 : vector<8x64xi1>, vector<8x64xf32>
    %386 = math.absf %380 : vector<8x64xf32>
    %cst_135 = arith.constant 0.327591091 : f32
    %387 = vector.broadcast %cst_135 : f32 to vector<8x64xf32>
    %388 = arith.mulf %387, %386 : vector<8x64xf32>
    %cst_136 = arith.constant 1.000000e+00 : f32
    %389 = vector.broadcast %cst_136 : f32 to vector<8x64xf32>
    %390 = arith.addf %389, %388 : vector<8x64xf32>
    %391 = tpu.reciprocal %390 : vector<8x64xf32> -> vector<8x64xf32>
    %cst_137 = arith.constant 1.06140542 : f32
    %392 = vector.broadcast %cst_137 : f32 to vector<8x64xf32>
    %393 = arith.mulf %392, %391 : vector<8x64xf32>
    %cst_138 = arith.constant -1.45315206 : f32
    %394 = vector.broadcast %cst_138 : f32 to vector<8x64xf32>
    %395 = arith.addf %393, %394 : vector<8x64xf32>
    %396 = arith.mulf %395, %391 : vector<8x64xf32>
    %cst_139 = arith.constant 1.42141378 : f32
    %397 = vector.broadcast %cst_139 : f32 to vector<8x64xf32>
    %398 = arith.addf %396, %397 : vector<8x64xf32>
    %399 = arith.mulf %398, %391 : vector<8x64xf32>
    %cst_140 = arith.constant -0.284496725 : f32
    %400 = vector.broadcast %cst_140 : f32 to vector<8x64xf32>
    %401 = arith.addf %399, %400 : vector<8x64xf32>
    %402 = arith.mulf %401, %391 : vector<8x64xf32>
    %cst_141 = arith.constant 0.254829586 : f32
    %403 = vector.broadcast %cst_141 : f32 to vector<8x64xf32>
    %404 = arith.addf %402, %403 : vector<8x64xf32>
    %405 = arith.mulf %404, %391 : vector<8x64xf32>
    %cst_142 = arith.constant 0.000000e+00 : f32
    %406 = vector.broadcast %cst_142 : f32 to vector<8x64xf32>
    %407 = arith.subf %406, %386 : vector<8x64xf32>
    %408 = arith.mulf %407, %386 : vector<8x64xf32>
    %409 = math.exp %408 : vector<8x64xf32>
    %410 = arith.mulf %405, %409 : vector<8x64xf32>
    %cst_143 = arith.constant 1.000000e+00 : f32
    %411 = vector.broadcast %cst_143 : f32 to vector<8x64xf32>
    %412 = arith.subf %411, %410 : vector<8x64xf32>
    %413 = arith.mulf %385, %412 : vector<8x64xf32>
    %cst_144 = arith.constant 1.000000e+00 : f32
    %414 = vector.broadcast %cst_144 : f32 to vector<8x64xf32>
    %415 = arith.addf %414, %413 : vector<8x64xf32>
    %416 = arith.mulf %378, %415 : vector<8x64xf32>
    %cst_145 = arith.constant dense<0.000000e+00> : vector<8x16xf32>
    %417 = tpu.matmul %416, %303, %cst_145 {dimension_numbers = #tpu.dot_dimension_numbers<[1], [0], [0], [1], [0, 0, 1, 1], [], []>} : vector<8x64xf32>, vector<64x16xf32>, vector<8x16xf32> -> vector<8x16xf32>
    %418 = vector.broadcast %311 : vector<1x16xf32> to vector<8x16xf32>
    %419 = arith.addf %417, %418 : vector<8x16xf32>
    %420 = arith.addf %419, %373 : vector<8x16xf32>
    %cst_146 = arith.constant dense<0.000000e+00> : vector<8xf32>
    %421 = vector.multi_reduction <add>, %420, %cst_146 [1] : vector<8x16xf32> to vector<8xf32>
    %422 = vector.shape_cast %421 : vector<8xf32> to vector<8x1xf32>
    %cst_147 = arith.constant 1.600000e+01 : f32
    %423 = vector.broadcast %cst_147 : f32 to vector<8x1xf32>
    %424 = arith.divf %422, %423 : vector<8x1xf32>
    %425 = vector.broadcast %424 : vector<8x1xf32> to vector<8x16xf32>
    %426 = arith.subf %420, %425 : vector<8x16xf32>
    %427 = arith.mulf %426, %426 : vector<8x16xf32>
    %cst_148 = arith.constant dense<0.000000e+00> : vector<8xf32>
    %428 = vector.multi_reduction <add>, %427, %cst_148 [1] : vector<8x16xf32> to vector<8xf32>
    %429 = vector.shape_cast %428 : vector<8xf32> to vector<8x1xf32>
    %cst_149 = arith.constant 1.600000e+01 : f32
    %430 = vector.broadcast %cst_149 : f32 to vector<8x1xf32>
    %431 = arith.divf %429, %430 : vector<8x1xf32>
    %cst_150 = arith.constant 9.99999996E-13 : f32
    %432 = vector.broadcast %cst_150 : f32 to vector<8x1xf32>
    %433 = arith.addf %431, %432 : vector<8x1xf32>
    %434 = math.rsqrt %433 : vector<8x1xf32>
    %435 = vector.broadcast %424 : vector<8x1xf32> to vector<8x16xf32>
    %436 = arith.subf %420, %435 : vector<8x16xf32>
    %437 = vector.broadcast %434 : vector<8x1xf32> to vector<8x16xf32>
    %438 = arith.mulf %436, %437 : vector<8x16xf32>
    %439 = vector.broadcast %312 : vector<1x16xf32> to vector<8x16xf32>
    %440 = arith.mulf %438, %439 : vector<8x16xf32>
    %441 = vector.broadcast %313 : vector<1x16xf32> to vector<8x16xf32>
    %442 = arith.addf %440, %441 : vector<8x16xf32>
    %c0_151 = arith.constant 0 : index
    %c0_152 = arith.constant 0 : index
    %c0_153 = arith.constant 0 : index
    %443 = vector.load %arg3[%c0_151, %c0_152, %c0_153] : memref<1x8x16xf32, #tpu.memory_space<vmem>>, vector<1x8x16xf32>
    %444 = vector.shape_cast %443 : vector<1x8x16xf32> to vector<8x16xf32>
    %445 = vector.shape_cast %442 : vector<8x16xf32> to vector<1x8x16xf32>
    tpu.vector_store %arg3[%c0_151, %c0_152, %c0_153], %445 {strides = array<i32>} : memref<1x8x16xf32, #tpu.memory_space<vmem>>, vector<1x8x16xf32>,
    return
  }
  func.func @transform_0(%arg0: i32) -> (i32, i32, i32) {
    %c0_i32 = arith.constant 0 : i32
    %c0_i32_0 = arith.constant 0 : i32
    %c0_i32_1 = arith.constant 0 : i32
    return %arg0, %c0_i32, %c0_i32_0 : i32, i32, i32
  }
  func.func @transform_1(%arg0: i32) -> (i32, i32, i32) {
    %c0_i32 = arith.constant 0 : i32
    %c0_i32_0 = arith.constant 0 : i32
    %c0_i32_1 = arith.constant 0 : i32
    %c0_i32_2 = arith.constant 0 : i32
    return %c0_i32, %c0_i32_0, %c0_i32_1 : i32, i32, i32
  }
  func.func @transform_2(%arg0: i32) -> (i32, i32, i32) {
    %c0_i32 = arith.constant 0 : i32
    %c0_i32_0 = arith.constant 0 : i32
    %c0_i32_1 = arith.constant 0 : i32
    return %arg0, %c0_i32, %c0_i32_0 : i32, i32, i32
  }
}

</mosaic_0001>

<bundles_post_ra>
// kernel: tpu_custom_call.1
= control target key start
LH: loop header
LB: loop body
LE: loop exit
PB: predicated region body
PF: predicated region fallthrough
CT: control target
= control target key end

     0   :  { %7 = vsyncpa [#allocation3], 0  ;;  %s1986_s0 = inlined_call_operand.hbm [shape: f32[2,8,16], index: 0, kind: input, shape index: {}]   ;;  %s1987_s1 = inlined_call_operand.hbm [shape: f32[3,120,128], index: 1, kind: input, shape index: {}]   ;;  %s1988_s2 = inlined_call_operand.hbm [shape: f32[2,8,16], index: 2, kind: output, shape index: {}]  }
   0x1   :  { %9 = vsyncpa [#allocation3 + $0x1], 0 }
   0x2   :  { %10 = vsyncpa [#allocation6], 0 }
   0x3   :  { %11 = vsyncpa [#allocation4], 0 }
   0x4   :  { %13 = vsyncpa [#allocation4 + $0x1], 0  ;;  %s1699_s9 = smov 0   ;;  %s1701_s10 = smov 0  }
   0x5   :  { %s1703_s11 = smov 0   ;;  %s1705_s12 = smov 0  }
   0x6 LB: > { %s108_s15 = sshll.u32 %s1987_s1, 4  ;;  %s1723_s16 = sadd.s32 4294967295, %s1671_s12   ;;  %s1671_s12 = sphi %s1705_s12, %s1998_s12   ;;  %s1667_s11 = sphi %s1703_s11, %s1997_s11   ;;  %s1663_s10 = sphi %s1701_s10, %s1996_s10   ;;  %s1659_s9 = sphi %s1699_s9, %s1995_s9   ;;  %s109_s15 = int_to_ptr.hbm [resolvable:$true] %s108_s15 }
   0x7   : > { %p1381_p0 = scmp.ge.s32.totalorder %s1671_s12, 1  ;;  %p40_p1 = scmp.eq.s32.totalorder %s1723_s16, 0 }
   0x8   : > { %p97_p2 = scmp.lt.s32.totalorder %s1671_s12, 3  ;;  %s1673_s18 = smov [#allocation5]  }
   0x9   : > { %s110_s19 = sshll.u32 %s1673_s18, 4  ;;  %s1674_s20 = smov 128   ;;  %s111_s19 = int_to_ptr.vmem [resolvable:$true] %s110_s19 }
   0xa   : > { %p1728_p3 = pnand %p1381_p0, %p97_p2  ;;  %s1675_s21 = smov 8  }
   0xb   : > { %s1380_s22 = sadd.s32 4294967294, %s1671_s12   ;;  %s1739_s23 = sadd.s32 1, %s1671_s12  }
   0xc   : > { %p1432_p4 = pneg %p1728_p3  ;;  %s26_s24 = sadd.s32 1, %s1667_s11 }
   0xd   : > { %s23_s25 = ssub.s32 %s1671_s12, %s1739_s23  ;;  %p33_p7 = scmp.ne.s32.totalorder %s1667_s11, %s1663_s10 }
   0xe   : > { %p1433_p6 = pnand %p1432_p4, %p40_p1  ;;  %p24_p8 = scmp.eq.s32.totalorder %s23_s25, 0 }
   0xf   : > { %p34_p9 = scmp.eq.s32.totalorder %s1671_s12, 0  ;;  %p39_p10 = scmp.ne.s32.totalorder %s1663_s10, %s1659_s9 }
  0x10   : > { %1435 = dma.hbm_to_vmem [thread:$0]  (!%p1433_p6), %s109_s15, 5760, %s111_s19, [#allocation6], %s1674_s20, %s1674_s20, %s1675_s21  }
  0x11   : > { %p84_p11 = scmp.eq.s32.totalorder %s1723_s16, 1  ;;  %p1755_p12 = por %p40_p1, %p39_p10 }
  0x12   : > { %s1751_s26 = scalar_select %p24_p8, %s1667_s11, %s26_s24  }
  0x13   : > { %p1759_p13 = por %p84_p11, %p33_p7  ;;  %p90_p0 = scmp.eq.s32.totalorder %s1380_s22, 1 }
  0x14   : > { %p35_p2 = por %p34_p9, %p33_p7  ;;  %s124_s29 = sand.u32 1, %s1667_s11  }
  0x15   : > { %p1764_p4 = por %p90_p0, %p39_p10  ;;  %p1445_p6 = scmp.lt.s32.totalorder %s1671_s12, 2 }
  0x16   : > { %s1384_s3 = sshll.u32 %s124_s29, 3  ;;  %s1385_s4 = sshll.u32 %s1671_s12, 3 }
  0x17   : > { %s132_s7 = scalar_lea.hbm %s1986_s0, %s1385_s4  ;;  %s128_s13 = scalar_lea.vmem [#allocation2], %s1384_s3 }
  0x18   : > { %s134_s8 = sshll.u32 %s132_s7, 4  ;;  %s136_s14 = sshll.u32 %s128_s13, 4  ;;  %s135_s8 = int_to_ptr.hbm [resolvable:$true] %s134_s8  ;;  %s137_s14 = int_to_ptr.vmem [resolvable:$true] %s136_s14 }
  0x19   : > { %p1773_p8 = pnand %p1445_p6, %p35_p2  ;;  %s125_s18 = scalar_lea.sflag [#allocation3], %s124_s29 }
  0x1a   : > { %s1571_s19 = sshra.s32 %s135_s8, 4  ;;  %s1578_s24 = scalar_lea.hbm %s1986_s0, 16  ;;  %s1572_s19 = int_to_ptr.hbm [resolvable:$true] %s1571_s19 }
  0x1b   : > { %s1573_s20 = scalar_lea.hbm %s1572_s19, 8  ;;  %p1575_p9 = pneg %p1773_p8 }
  0x1c   : > { %p1574_p7 = scmp.ne.s32.totalorder %s1572_s19, %s1573_s20  ;;  %p1579_p0 = scmp.lt.s32.totalorder %s1572_s19, %s1986_s0 }
  0x1d   : > { %p1580_p2 = scmp.lt.s32.totalorder %s1578_s24, %s1573_s20 }
  0x1e   : > { %p1576_p10 = pnand %p1575_p9, %p1574_p7 }
  0x1f   : > { %p1581_p6 = por %p1580_p2, %p1579_p0 }
  0x20   : > { %p1577_p11 = pneg %p1576_p10 }
  0x22   : > { %p1582_p5 = pnand %p1581_p6, %p1577_p11 }
  0x24   : > { %1585 = shalt.err (!%p1582_p5)
}
  0x25   : > { %1439 = dma.hbm_to_vmem [thread:$0]  (!%p1773_p8), %s135_s8, 128, %s137_s14, %s125_s18  }
  0x26   : > { %145 = sbr.rel (%p1728_p3) target bundleno = 5653 (0x1615), region = 28  ;;  %s1790_s29 = sand.u32 (!%p1728_p3), 1, %s1663_s10  }
  0x27   : > { %s1387_s4 = sshll.u32 (!%p1728_p3), %s1790_s29, 3  ;;  %s148_s5 = scalar_lea.sflag (!%p1728_p3), [#allocation3], %s1790_s29 }
  0x28   : > { %s151_s6 = scalar_lea.vmem (!%p1728_p3), [#allocation2], %s1387_s4 }
  0x2b   : > { %1646 = dma.done.wait (%p1755_p12), %s148_s5, 128  }
  0x2c   : > { %1648 = vsyncadd (%p1755_p12), %s148_s5, 4294967168 }
  0x2d   : > { %1650 = dma.done.wait (%p40_p1), [#allocation6], 5760  }
  0x2e   : > { %1652 = vsyncadd (%p40_p1), [#allocation6], 4294961536  ;;  %v180_v0 = vld [vmem:[#allocation5 + $0x8] sm:$0xff]  ;;  %v179_v1 = vld [vmem:[#allocation5] sm:$0xff]  ;;  %vm195_vm0 = vcmask 130048   ;;  %s1676_s17 = smov 120  }
  0x2f   : > { %213 = vmatpush.msra.mxu1 %v180_v0  ;;  %v1804_v2 = vld [vmem:[%s151_s6] sm:$0xff]  ;;  %s1677_s27 = smov 112   ;;  %s1678_s7 = smov 104   ;;  %vm222_vm1 = vcmask 64512   ;;  %v1682_v61 = vmov 16.0  }
  0x30   : > { %v1808_v3 = vld [vmem:[#allocation5 + $0x70] sm:$0xff]  ;;  %s1679_s8 = smov 96   ;;  %s1680_s13 = smov 88   ;;  %v182_v50 = vld [vmem:[#allocation5 + $0x18] sm:$0xff] }
  0x31   : > { %214 = vmatpush.msra.mxu1 %v179_v1  ;;  %v194_v4 = vperm.slane %v1808_v3, 0  ;;  %398 = vmatpush.msra.mxu0 %v182_v50  ;;  %s1681_s14 = smov 8   ;;  %v181_v53 = vld [vmem:[#allocation5 + $0x10] sm:$0xff]  ;;  %v380_v56 = vperm.slane %v1808_v3, 1  ;;  %s1421_s15 = sshll.u32 %s1723_s16, 3 }
  0x32   : > { %1390 = vmatmul.msk.f32.vlgmr.msra.gmra.mxu1 %vm195_vm0, %v1804_v2  ;;  %s1295_s20 = scalar_lea.hbm %s1988_s2, %s1421_s15  ;;  %s177_s21 = scalar_lea.vmem [#allocation7], %s1387_s4 }
  0x33   : > { %399 = vmatpush.msra.mxu0 %v181_v53  ;;  %s1297_s22 = sshll.u32 %s177_s21, 4  ;;  %s1299_s24 = sshll.u32 %s1295_s20, 4  ;;  %s1298_s22 = int_to_ptr.vmem [resolvable:$true] %s1297_s22  ;;  %s1300_s24 = int_to_ptr.hbm [resolvable:$true] %s1299_s24 }
  0x34   : > { %s1285_s16 = scalar_lea.sflag [#allocation4], %s1790_s29  ;;  %s1615_s25 = sshra.s32 %s1300_s24, 4  ;;  %s1616_s25 = int_to_ptr.hbm [resolvable:$true] %s1615_s25 }
  0x35   : > { %s1617_s3 = scalar_lea.hbm %s1616_s25, 8  ;;  %s1621_s4 = scalar_lea.hbm %s1988_s2, 16 }
  0x36   : > { %p1618_p1 = scmp.ne.s32.totalorder %s1616_s25, %s1617_s3  ;;  %p1622_p12 = scmp.lt.s32.totalorder %s1616_s25, %s1988_s2 }
  0x37   : > { %p1623_p8 = scmp.lt.s32.totalorder %s1621_s4, %s1617_s3 }
  0x38   : > { %p1619_p3 = pnand %p1618_p1, %p1759_p13 }
  0x39   : > { %p1624_p7 = por %p1623_p8, %p1622_p12 }
  0x3a   : > { %p1620_p5 = pneg %p1619_p3 }
  0x3c   : > { %p1625_p9 = pnand %p1624_p7, %p1620_p5 }
  0xaf   : > { %v216_v5 = vpop.f32.mrf.mxu1 }
  0xb0   : > { %v217_v6 = vadd.f32 %v216_v5, %v194_v4 }
  0xb2   : > { %297 = vrot.lane.b32.xlu1 %v217_v6, %s1676_s17  ;;  %220 = vrot.lane.b32.xlu0 %v217_v6, %s1677_s27 }
  0xba   : > { %299 = vrot.lane.b32.xlu0 %v217_v6, %s1678_s7 }
 0x124   : > { %v221_v7 = vpop.permute.xlu0 %220  ;;  %v298_v9 = vpop.permute.xlu1 %297 }
 0x125   : > { %1391 = vmatpush.xpose.msk.msrb.mxu1 %vm222_vm1, %v221_v7 }
 0x128   : > { %1392 = vmatmul.msk.f32.vlgmr.msrb.gmra.mxu1 %vm222_vm1, %v217_v6 }
 0x12c   : > { %v300_v8 = vpop.permute.xlu0 %299 }
 0x12d   : > { %1394 = vmatpush.xpose.msk.msra.mxu3 %vm222_vm1, %v300_v8 }
 0x130   : > { %1395 = vmatmul.msk.f32.vlgmr.msra.gmra.mxu3 %vm222_vm1, %v298_v9 }
 0x1a5   : > { %v244_v10 = vpop.f32.mrf.mxu1 }
 0x1a6   : > { %v247_v11 = vsel %vm222_vm1, %v244_v10, -inf }
 0x1a7   : > { %248 = vmax.xlane.f32.xlu1 %v247_v11  ;;  %v183_v11 = vld [vmem:[#allocation5 + $0x20] sm:$0xff] }
 0x1b3   : > { %v322_v12 = vpop.f32.mrf.mxu3 }
 0x1b4   : > { %v325_v13 = vsel %vm222_vm1, %v322_v12, -inf }
 0x1b5   : > { %326 = vmax.xlane.f32.xlu2 %v325_v13 }
 0x21a   : > { %v249_v14 = vpop.xlane.xlu1 %248 }
 0x21b   : > { %v250_v15 = vsub.f32 %v244_v10, %v249_v14  ;;  %v184_v10 = vld [vmem:[#allocation5 + $0x28] sm:$0xff] }
 0x21c   : > { %456 = vmatpush.msra.mxu1 %v184_v10 }
 0x21d   : > { %v251_v16 = vmul.f32 1.442695, %v250_v15 }
 0x21e   : > { %457 = vmatpush.msra.mxu1 %v183_v11  ;;  %v501_v11 = vperm.slane %v1808_v3, 5 }
 0x21f   : > { %1491 = vpow2.f32 %v251_v16 }
 0x225   : > { %v1492_v17 = vpop.eup %1491 }
 0x226   : > { %v253_v18 = vsel %vm222_vm1, %v1492_v17, 0.0 }
 0x227   : > { %254 = vadd.xlane.f32.xlu2 %v253_v18 }
 0x228   : > { %v327_v19 = vpop.xlane.xlu2 %326 }
 0x229   : > { %v328_v20 = vsub.f32 %v322_v12, %v327_v19 }
 0x22b   : > { %v329_v21 = vmul.f32 1.442695, %v328_v20 }
 0x22d   : > { %1493 = vpow2.f32 %v329_v21  ;;  %v434_v21 = vperm.slane %v1808_v3, 2 }
 0x233   : > { %v1494_v22 = vpop.eup %1493 }
 0x234   : > { %v331_v23 = vsel %vm222_vm1, %v1494_v22, 0.0 }
 0x235   : > { %332 = vadd.xlane.f32.xlu0 %v331_v23 }
 0x23f   : > { %271 = vrot.lane.b32.xlu2 %v217_v6, %s1679_s8 }
 0x247   : > { %349 = vrot.lane.b32.xlu2 %v217_v6, %s1680_s13 }
 0x29a   : > { %v255_v24 = vpop.xlane.xlu2 %254 }
 0x29b   : > { %1495 = vrcp.f32 %v255_v24  ;;  %v267_v29 = vand.u32 2147483648, %v255_v24  ;;  %v265_v31 = vand.u32 2147483647, %v255_v24  ;;  %vm261_vm3 = vweird.f32 %v255_v24 }
 0x29d   : > { %v268_v34 = vor.u32 1.1754944e-38, %v267_v29  ;;  %vm266_vm5 = vcmp.eq.f32.partialorder %v265_v31, 8.507059e+37 }
 0x2a1   : > { %v1496_v25 = vpop.eup %1495 }
 0x2a2   : > { %v257_v26 = vmul.f32 %v1496_v25, %v255_v24  ;;  %v272_v27 = vpop.permute.xlu2 %271  ;;  %vm262_vm2 = vweird.f32 %v1496_v25  ;;  %v436_v24 = vperm.slane %v1808_v3, 3 }
 0x2a3   : > { %292 = vmatpush.msra.mxu2 %v272_v27  ;;  %vm263_vm4 = vmor %vm261_vm3, %vm262_vm2  ;;  %v438_v27 = vperm.slane %v1808_v3, 4 }
 0x2a4   : > { %v258_v28 = vsub.f32 1.0, %v257_v26 }
 0x2a6   : > { %v259_v30 = vmul.f32 %v1496_v25, %v258_v28 }
 0x2a8   : > { %v333_v32 = vpop.xlane.xlu0 %332  ;;  %v260_v33 = vadd.f32 %v1496_v25, %v259_v30 }
 0x2a9   : > { %1497 = vrcp.f32 %v333_v32  ;;  %v345_v42 = vand.u32 2147483648, %v333_v32  ;;  %v343_v44 = vand.u32 2147483647, %v333_v32  ;;  %vm339_vm7 = vweird.f32 %v333_v32 }
 0x2aa   : > { %v350_v35 = vpop.permute.xlu2 %349  ;;  %v264_v36 = vsel %vm263_vm4, %v1496_v25, %v260_v33  ;;  %1499 = vrcp.f32 %v1682_v61 }
 0x2ab   : > { %370 = vmatpush.msrb.mxu2 %v350_v35  ;;  %v269_v37 = vsel %vm266_vm5, %v268_v34, %v264_v36  ;;  %v346_v46 = vor.u32 1.1754944e-38, %v345_v42  ;;  %vm344_vm9 = vcmp.eq.f32.partialorder %v343_v44, 8.507059e+37  ;;  %v192_v34 = vld [vmem:[#allocation5 + $0x68] sm:$0xff]  ;;  %v191_v35 = vld [vmem:[#allocation5 + $0x60] sm:$0xff]  ;;  %v190_v36 = vld [vmem:[#allocation5 + $0x58] sm:$0xff]  ;;  %vm502_vm5 = vcmask 523264  }
 0x2ac   : > { %v270_v38 = vmul.f32 %v1492_v17, %v269_v37  ;;  %514 = vmatpush.msrb.mxu3 %v192_v34  ;;  %v189_v37 = vld [vmem:[#allocation5 + $0x50] sm:$0xff]  ;;  %v186_v44 = vld [vmem:[#allocation5 + $0x38] sm:$0xff] }
 0x2ae   : > { %1393 = vmatmul.msk.f32.vlgmr.msra.gmra.mxu2 %vm222_vm1, %v270_v38  ;;  %515 = vmatpush.msrb.mxu3 %v191_v35  ;;  %v551_v35 = vperm.slane %v1808_v3, 7 }
 0x2af   : > { %v1498_v39 = vpop.eup %1497 }
 0x2b0   : > { %v335_v40 = vmul.f32 %v1498_v39, %v333_v32  ;;  %vm340_vm6 = vweird.f32 %v1498_v39  ;;  %v1500_v62 = vpop.eup %1499  ;;  %516 = vmatpush.msrb.mxu3 %v190_v36 }
 0x2b1   : > { %vm341_vm8 = vmor %vm339_vm7, %vm340_vm6  ;;  %v409_v63 = vmul.f32 16.0, %v1500_v62  ;;  %vm413_vm10 = vweird.f32 %v1500_v62 }
 0x2b2   : > { %v336_v41 = vsub.f32 1.0, %v335_v40  ;;  %517 = vmatpush.msrb.mxu3 %v189_v37 }
 0x2b3   : > { %v410_v0 = vsub.f32 1.0, %v409_v63 }
 0x2b4   : > { %v337_v43 = vmul.f32 %v1498_v39, %v336_v41  ;;  %v187_v41 = vld [vmem:[#allocation5 + $0x40] sm:$0xff] }
 0x2b5   : > { %v411_v1 = vmul.f32 %v1500_v62, %v410_v0 }
 0x2b6   : > { %v338_v45 = vadd.f32 %v1498_v39, %v337_v43 }
 0x2b7   : > { %v412_v4 = vadd.f32 %v1500_v62, %v411_v1 }
 0x2b8   : > { %v342_v47 = vsel %vm341_vm8, %v1498_v39, %v338_v45  ;;  %v188_v39 = vld [vmem:[#allocation5 + $0x48] sm:$0xff] }
 0x2b9   : > { %v347_v48 = vsel %vm344_vm9, %v346_v46, %v342_v47  ;;  %v1832_v5 = vsel %vm413_vm10, %v1500_v62, %v412_v4  ;;  %518 = vmatpush.msrb.mxu3 %v188_v39  ;;  %v185_v47 = vld [vmem:[#allocation5 + $0x30] sm:$0xff] }
 0x2ba   : > { %v348_v49 = vmul.f32 %v1494_v22, %v347_v48 }
 0x2bb   : > { %519 = vmatpush.msrb.mxu3 %v187_v41 }
 0x2bc   : > { %1396 = vmatmul.msk.f32.vlgmr.msrb.gmra.mxu2 %vm222_vm1, %v348_v49 }
 0x2bd   : > { %520 = vmatpush.msrb.mxu3 %v186_v44 }
 0x2bf   : > { %521 = vmatpush.msrb.mxu3 %v185_v47 }
 0x331   : > { %v294_v51 = vpop.f32.mrf.mxu2 }
 0x33f   : > { %v372_v52 = vpop.f32.mrf.mxu2 }
 0x340   : > { %376 = vrot.lane.b32.xlu2 %v372_v52, %s1681_s14 }
 0x39a   : > { %v377_v54 = vpop.permute.xlu2 %376 }
 0x39b   : > { %v379_v55 = vsel %vm222_vm1, %v294_v51, %v377_v54 }
 0x39c   : > { %1397 = vmatmul.msk.f32.vlgmr.msra.gmra.mxu0 %vm195_vm0, %v379_v55 }
 0x419   : > { %v401_v57 = vpop.f32.mrf.mxu0 }
 0x41a   : > { %v402_v58 = vadd.f32 %v401_v57, %v380_v56 }
 0x41c   : > { %v404_v59 = vadd.f32 %v402_v58, %v1804_v2 }
 0x41e   : > { %v405_v60 = vsel %vm195_vm0, %v404_v59, 0.0 }
 0x41f   : > { %406 = vadd.xlane.f32.xlu1 %v405_v60 }
 0x492   : > { %v407_v6 = vpop.xlane.xlu1 %406 }
 0x493   : > { %v415_v7 = vmul.f32 %v1832_v5, %v407_v6  ;;  %v1683_v6 = vmov 1.0  }
 0x495   : > { %v416_v8 = vsub.f32 %v404_v59, %v415_v7 }
 0x497   : > { %v417_v9 = vmul.f32 %v416_v8, %v416_v8 }
 0x499   : > { %v418_v2 = vsel %vm195_vm0, %v417_v9, 0.0 }
 0x49a   : > { %419 = vadd.xlane.f32.xlu2 %v418_v2 }
 0x50d   : > { %v420_v12 = vpop.xlane.xlu2 %419 }
 0x50e   : > { %v421_v13 = vmul.f32 %v420_v12, %v1832_v5 }
 0x510   : > { %v422_v14 = vadd.f32 1e-12, %v421_v13 }
 0x512   : > { %1501 = vrsqrt.f32 %v422_v14  ;;  %vm429_vm12 = vweird.f32 %v422_v14 }
 0x518   : > { %v1502_v15 = vpop.eup %1501 }
 0x519   : > { %v424_v16 = vmul.f32 %v1502_v15, %v422_v14  ;;  %vm430_vm11 = vweird.f32 %v1502_v15 }
 0x51a   : > { %vm431_vm13 = vmor %vm429_vm12, %vm430_vm11 }
 0x51b   : > { %v425_v17 = vmul.f32 %v1502_v15, %v424_v16 }
 0x51d   : > { %v426_v18 = vmul.f32 0.5, %v425_v17 }
 0x51f   : > { %v427_v19 = vsub.f32 1.5, %v426_v18 }
 0x521   : > { %v428_v20 = vmul.f32 %v1502_v15, %v427_v19 }
 0x523   : > { %v432_v22 = vsel %vm431_vm13, %v1502_v15, %v428_v20 }
 0x524   : > { %v433_v23 = vmul.f32 %v432_v22, %v416_v8  ;;  %v554_v22 = vld [vmem:[#allocation5 + $0x78] sm:$0xff] }
 0x526   : > { %v435_v25 = vmul.f32 %v434_v21, %v433_v23  ;;  %v555_v21 = vld [vmem:[#allocation5 + $0x80] sm:$0xff] }
 0x527   : > { %587 = vmatpush.msra.mxu2 %v555_v21 }
 0x528   : > { %v1839_v26 = vadd.f32 %v436_v24, %v435_v25 }
 0x529   : > { %588 = vmatpush.msra.mxu2 %v554_v22 }
 0x52a   : > { %1398 = vmatmul.msk.f32.vlgmr.msra.gmra.mxu1 %vm195_vm0, %v1839_v26 }
 0x5a7   : > { %v459_v28 = vpop.f32.mrf.mxu1 }
 0x5a8   : > { %v460_v29 = vadd.f32 %v459_v28, %v438_v27 }
 0x5aa   : > { %v463_v30 = vmul.f32 0.70710677, %v460_v29  ;;  %v462_v9 = vmul.f32 0.5, %v460_v29 }
 0x5ac   : > { %v466_v31 = vand.u32 2147483647, %v463_v30  ;;  %vm464_vm4 = vcmp.lt.f32.partialorder %v463_v30, 0.0 }
 0x5ad   : > { %v465_v7 = vsel %vm464_vm4, -1.0, %v1683_v6 }
 0x5ae   : > { %v467_v32 = vmul.f32 0.3275911, %v466_v31  ;;  %v492_v52 = vsub.f32 0.0, %v466_v31 }
 0x5b0   : > { %v468_v33 = vadd.f32 1.0, %v467_v32  ;;  %v493_v55 = vmul.f32 %v492_v52, %v466_v31  ;;  %v549_v32 = vperm.slane %v1808_v3, 6 }
 0x5b2   : > { %1503 = vrcp.f32 %v468_v33  ;;  %v480_v43 = vand.u32 2147483648, %v468_v33  ;;  %v478_v46 = vand.u32 2147483647, %v468_v33  ;;  %vm474_vm15 = vweird.f32 %v468_v33 }
 0x5b3   : > { %v494_v58 = vmul.f32 1.442695, %v493_v55 }
 0x5b4   : > { %v481_v49 = vor.u32 1.1754944e-38, %v480_v43  ;;  %vm479_vm3 = vcmp.eq.f32.partialorder %v478_v46, 8.507059e+37 }
 0x5b5   : > { %1505 = vpow2.f32 %v494_v58 }
 0x5b8   : > { %v1504_v38 = vpop.eup %1503 }
 0x5b9   : > { %v470_v40 = vmul.f32 %v1504_v38, %v468_v33  ;;  %vm475_vm14 = vweird.f32 %v1504_v38 }
 0x5ba   : > { %vm476_vm2 = vmor %vm474_vm15, %vm475_vm14 }
 0x5bb   : > { %v471_v42 = vsub.f32 1.0, %v470_v40  ;;  %v1506_v0 = vpop.eup %1505 }
 0x5bd   : > { %v472_v45 = vmul.f32 %v1504_v38, %v471_v42 }
 0x5bf   : > { %v473_v48 = vadd.f32 %v1504_v38, %v472_v45 }
 0x5c1   : > { %v477_v50 = vsel %vm476_vm2, %v1504_v38, %v473_v48  ;;  %v1858_v38 = vld [vmem:[#allocation5 + $0xe8] sm:$0xff] }
 0x5c2   : > { %v482_v51 = vsel %vm479_vm3, %v481_v49, %v477_v50  ;;  %v569_v39 = vperm.slane %v1858_v38, 0 }
 0x5c3   : > { %v483_v53 = vmul.f32 1.0614054, %v482_v51 }
 0x5c5   : > { %v484_v54 = vadd.f32 -1.4531521, %v483_v53 }
 0x5c7   : > { %v485_v56 = vmul.f32 %v484_v54, %v482_v51 }
 0x5c9   : > { %v486_v57 = vadd.f32 1.4214138, %v485_v56 }
 0x5cb   : > { %v487_v59 = vmul.f32 %v486_v57, %v482_v51 }
 0x5cd   : > { %v488_v60 = vadd.f32 -0.28449672, %v487_v59 }
 0x5cf   : > { %v489_v61 = vmul.f32 %v488_v60, %v482_v51 }
 0x5d1   : > { %v490_v62 = vadd.f32 0.2548296, %v489_v61 }
 0x5d3   : > { %v491_v63 = vmul.f32 %v490_v62, %v482_v51 }
 0x5d5   : > { %v496_v1 = vmul.f32 %v1506_v0, %v491_v63 }
 0x5d7   : > { %v497_v4 = vsub.f32 1.0, %v496_v1 }
 0x5d9   : > { %v498_v8 = vmul.f32 %v497_v4, %v465_v7 }
 0x5db   : > { %v499_v2 = vadd.f32 1.0, %v498_v8 }
 0x5dd   : > { %v500_v10 = vmul.f32 %v499_v2, %v462_v9 }
 0x5df   : > { %1399 = vmatmul.msk.f32.vlgmr.msrb.gmra.mxu3 %vm502_vm5, %v500_v10 }
 0x662   : > { %v523_v12 = vpop.f32.mrf.mxu3 }
 0x663   : > { %v524_v13 = vadd.f32 %v523_v12, %v501_v11 }
 0x665   : > { %v526_v14 = vadd.f32 %v524_v13, %v1839_v26 }
 0x667   : > { %v527_v15 = vsel %vm195_vm0, %v526_v14, 0.0 }
 0x668   : > { %528 = vadd.xlane.f32.xlu0 %v527_v15 }
 0x6db   : > { %v529_v16 = vpop.xlane.xlu0 %528 }
 0x6dc   : > { %v530_v17 = vmul.f32 %v529_v16, %v1832_v5 }
 0x6de   : > { %v531_v18 = vsub.f32 %v526_v14, %v530_v17 }
 0x6e0   : > { %v532_v19 = vmul.f32 %v531_v18, %v531_v18 }
 0x6e2   : > { %v533_v20 = vsel %vm195_vm0, %v532_v19, 0.0 }
 0x6e3   : > { %534 = vadd.xlane.f32.xlu1 %v533_v20 }
 0x756   : > { %v535_v23 = vpop.xlane.xlu1 %534 }
 0x757   : > { %v536_v24 = vmul.f32 %v535_v23, %v1832_v5 }
 0x759   : > { %v537_v25 = vadd.f32 1e-12, %v536_v24  ;;  %v557_v24 = vld [vmem:[#allocation5 + $0x90] sm:$0xff] }
 0x75b   : > { %1507 = vrsqrt.f32 %v537_v25  ;;  %vm544_vm7 = vweird.f32 %v537_v25 }
 0x761   : > { %v1508_v26 = vpop.eup %1507 }
 0x762   : > { %v539_v27 = vmul.f32 %v1508_v26, %v537_v25  ;;  %vm545_vm6 = vweird.f32 %v1508_v26  ;;  %v556_v25 = vld [vmem:[#allocation5 + $0x88] sm:$0xff] }
 0x763   : > { %vm546_vm8 = vmor %vm544_vm7, %vm545_vm6 }
 0x764   : > { %v540_v28 = vmul.f32 %v1508_v26, %v539_v27 }
 0x766   : > { %v541_v29 = vmul.f32 0.5, %v540_v28 }
 0x768   : > { %v542_v30 = vsub.f32 1.5, %v541_v29  ;;  %v753_v29 = vperm.slane %v1858_v38, 1 }
 0x76a   : > { %v543_v31 = vmul.f32 %v1508_v26, %v542_v30 }
 0x76c   : > { %v547_v33 = vsel %vm546_vm8, %v1508_v26, %v543_v31 }
 0x76d   : > { %v548_v34 = vmul.f32 %v547_v33, %v531_v18 }
 0x76f   : > { %v550_v36 = vmul.f32 %v549_v32, %v548_v34 }
 0x771   : > { %v1854_v37 = vadd.f32 %v551_v35, %v550_v36 }
 0x773   : > { %1400 = vmatmul.msk.f32.vlgmr.msra.gmra.mxu2 %vm195_vm0, %v1854_v37 }
 0x7f6   : > { %v590_v40 = vpop.f32.mrf.mxu2 }
 0x7f7   : > { %v591_v41 = vadd.f32 %v590_v40, %v569_v39 }
 0x7f9   : > { %670 = vrot.lane.b32.xlu1 %v591_v41, %s1676_s17  ;;  %672 = vrot.lane.b32.xlu0 %v591_v41, %s1678_s7 }
 0x801   : > { %594 = vrot.lane.b32.xlu0 %v591_v41, %s1677_s27 }
 0x86b   : > { %v673_v42 = vpop.permute.xlu0 %672  ;;  %v671_v3 = vpop.permute.xlu1 %670 }
 0x86c   : > { %1404 = vmatpush.xpose.msk.msrb.mxu2 %vm222_vm1, %v673_v42  ;;  %v558_v42 = vld [vmem:[#allocation5 + $0x98] sm:$0xff] }
 0x86f   : > { %1405 = vmatmul.msk.f32.vlgmr.msrb.gmra.mxu2 %vm222_vm1, %v671_v3 }
 0x873   : > { %v595_v43 = vpop.permute.xlu0 %594 }
 0x874   : > { %1401 = vmatpush.xpose.msk.msrb.mxu0 %vm222_vm1, %v595_v43 }
 0x877   : > { %1402 = vmatmul.msk.f32.vlgmr.msrb.gmra.mxu0 %vm222_vm1, %v591_v41 }
 0x8f2   : > { %v695_v44 = vpop.f32.mrf.mxu2 }
 0x8f3   : > { %v698_v45 = vsel %vm222_vm1, %v695_v44, -inf }
 0x8f4   : > { %699 = vmax.xlane.f32.xlu1 %v698_v45  ;;  %v617_v46 = vpop.f32.mrf.mxu0 }
 0x8f5   : > { %v620_v47 = vsel %vm222_vm1, %v617_v46, -inf }
 0x8f6   : > { %621 = vmax.xlane.f32.xlu0 %v620_v47 }
 0x90d   : > { %644 = vrot.lane.b32.xlu1 %v591_v41, %s1679_s8 }
 0x967   : > { %v700_v48 = vpop.xlane.xlu1 %699 }
 0x968   : > { %v701_v49 = vsub.f32 %v695_v44, %v700_v48 }
 0x969   : > { %v622_v54 = vpop.xlane.xlu0 %621 }
 0x96a   : > { %v702_v50 = vmul.f32 1.442695, %v701_v49  ;;  %v623_v55 = vsub.f32 %v617_v46, %v622_v54 }
 0x96c   : > { %1509 = vpow2.f32 %v702_v50  ;;  %v624_v56 = vmul.f32 1.442695, %v623_v55  ;;  %v800_v50 = vperm.slane %v1858_v38, 2 }
 0x96e   : > { %1511 = vpow2.f32 %v624_v56  ;;  %v804_v56 = vperm.slane %v1858_v38, 4 }
 0x972   : > { %v1510_v51 = vpop.eup %1509 }
 0x973   : > { %v704_v52 = vsel %vm222_vm1, %v1510_v51, 0.0 }
 0x974   : > { %705 = vadd.xlane.f32.xlu2 %v704_v52  ;;  %v1512_v57 = vpop.eup %1511 }
 0x975   : > { %v626_v58 = vsel %vm222_vm1, %v1512_v57, 0.0 }
 0x97f   : > { %v645_v53 = vpop.permute.xlu1 %644 }
 0x980   : > { %665 = vmatpush.msrb.mxu1 %v645_v53  ;;  %v802_v53 = vperm.slane %v1858_v38, 3 }
 0x982   : > { %771 = vmatpush.msra.mxu1 %v557_v24 }
 0x984   : > { %772 = vmatpush.msra.mxu1 %v556_v25 }
 0x98c   : > { %722 = vrot.lane.b32.xlu2 %v591_v41, %s1680_s13  ;;  %v559_v41 = vld [vmem:[#allocation5 + $0xa0] sm:$0xff] }
 0x98d   : > { %822 = vmatpush.msra.mxu3 %v559_v41 }
 0x98f   : > { %823 = vmatpush.msra.mxu3 %v558_v42  ;;  %v867_v42 = vperm.slane %v1858_v38, 5 }
 0x9b5   : > { %627 = vadd.xlane.f32.xlu2 %v626_v58 }
 0x9e7   : > { %v706_v59 = vpop.xlane.xlu2 %705 }
 0x9e8   : > { %1513 = vrcp.f32 %v706_v59  ;;  %v718_v0 = vand.u32 2147483648, %v706_v59  ;;  %v716_v4 = vand.u32 2147483647, %v706_v59  ;;  %vm712_vm10 = vweird.f32 %v706_v59 }
 0x9ea   : > { %v719_v8 = vor.u32 1.1754944e-38, %v718_v0  ;;  %vm717_vm12 = vcmp.eq.f32.partialorder %v716_v4, 8.507059e+37  ;;  %v566_v0 = vld [vmem:[#allocation5 + $0xd8] sm:$0xff]  ;;  %v564_v4 = vld [vmem:[#allocation5 + $0xc8] sm:$0xff] }
 0x9ee   : > { %v1514_v60 = vpop.eup %1513 }
 0x9ef   : > { %v708_v61 = vmul.f32 %v1514_v60, %v706_v59  ;;  %v723_v62 = vpop.permute.xlu2 %722  ;;  %vm713_vm9 = vweird.f32 %v1514_v60 }
 0x9f0   : > { %743 = vmatpush.msra.mxu0 %v723_v62  ;;  %vm714_vm11 = vmor %vm712_vm10, %vm713_vm9 }
 0x9f1   : > { %v709_v63 = vsub.f32 1.0, %v708_v61 }
 0x9f3   : > { %v710_v1 = vmul.f32 %v1514_v60, %v709_v63  ;;  %v567_v63 = vld [vmem:[#allocation5 + $0xe0] sm:$0xff] }
 0x9f4   : > { %879 = vmatpush.msra.mxu2 %v567_v63 }
 0x9f5   : > { %v711_v7 = vadd.f32 %v1514_v60, %v710_v1  ;;  %v565_v1 = vld [vmem:[#allocation5 + $0xd0] sm:$0xff] }
 0x9f6   : > { %880 = vmatpush.msra.mxu2 %v566_v0  ;;  %v916_v0 = vperm.slane %v1858_v38, 7 }
 0x9f7   : > { %v715_v9 = vsel %vm714_vm11, %v1514_v60, %v711_v7 }
 0x9f8   : > { %v720_v2 = vsel %vm717_vm12, %v719_v8, %v715_v9  ;;  %881 = vmatpush.msra.mxu2 %v565_v1  ;;  %v563_v8 = vld [vmem:[#allocation5 + $0xc0] sm:$0xff] }
 0x9f9   : > { %v721_v10 = vmul.f32 %v1510_v51, %v720_v2  ;;  %v562_v2 = vld [vmem:[#allocation5 + $0xb8] sm:$0xff] }
 0x9fa   : > { %882 = vmatpush.msra.mxu2 %v564_v4 }
 0x9fb   : > { %1406 = vmatmul.msk.f32.vlgmr.msra.gmra.mxu0 %vm222_vm1, %v721_v10 }
 0x9fc   : > { %883 = vmatpush.msra.mxu2 %v563_v8 }
 0x9fe   : > { %884 = vmatpush.msra.mxu2 %v562_v2 }
 0xa28   : > { %v628_v11 = vpop.xlane.xlu2 %627 }
 0xa29   : > { %1515 = vrcp.f32 %v628_v11  ;;  %v640_v15 = vand.u32 2147483648, %v628_v11  ;;  %v638_v17 = vand.u32 2147483647, %v628_v11  ;;  %vm634_vm14 = vweird.f32 %v628_v11 }
 0xa2b   : > { %v641_v19 = vor.u32 1.1754944e-38, %v640_v15  ;;  %vm639_vm2 = vcmp.eq.f32.partialorder %v638_v17, 8.507059e+37  ;;  %v560_v15 = vld [vmem:[#allocation5 + $0xa8] sm:$0xff] }
 0xa2f   : > { %v1516_v12 = vpop.eup %1515 }
 0xa30   : > { %v630_v13 = vmul.f32 %v1516_v12, %v628_v11  ;;  %vm635_vm13 = vweird.f32 %v1516_v12 }
 0xa31   : > { %vm636_vm15 = vmor %vm634_vm14, %vm635_vm13 }
 0xa32   : > { %v631_v14 = vsub.f32 1.0, %v630_v13 }
 0xa34   : > { %v632_v16 = vmul.f32 %v1516_v12, %v631_v14 }
 0xa36   : > { %v633_v18 = vadd.f32 %v1516_v12, %v632_v16 }
 0xa38   : > { %v637_v20 = vsel %vm636_vm15, %v1516_v12, %v633_v18  ;;  %v561_v12 = vld [vmem:[#allocation5 + $0xb0] sm:$0xff] }
 0xa39   : > { %v642_v21 = vsel %vm639_vm2, %v641_v19, %v637_v20  ;;  %885 = vmatpush.msra.mxu2 %v561_v12 }
 0xa3a   : > { %v643_v22 = vmul.f32 %v1512_v57, %v642_v21 }
 0xa3b   : > { %886 = vmatpush.msra.mxu2 %v560_v15 }
 0xa3c   : > { %1403 = vmatmul.msk.f32.vlgmr.msrb.gmra.mxu1 %vm222_vm1, %v643_v22 }
 0xa78   : > { %v745_v23 = vpop.f32.mrf.mxu0 }
 0xa79   : > { %749 = vrot.lane.b32.xlu0 %v745_v23, %s1681_s14 }
 0xab9   : > { %v667_v26 = vpop.f32.mrf.mxu1 }
 0xaeb   : > { %v750_v27 = vpop.permute.xlu0 %749 }
 0xaec   : > { %v752_v28 = vsel %vm222_vm1, %v667_v26, %v750_v27 }
 0xaed   : > { %1407 = vmatmul.msk.f32.vlgmr.msra.gmra.mxu1 %vm195_vm0, %v752_v28 }
 0xb6a   : > { %v774_v30 = vpop.f32.mrf.mxu1 }
 0xb6b   : > { %v775_v31 = vadd.f32 %v774_v30, %v753_v29 }
 0xb6d   : > { %v777_v32 = vadd.f32 %v775_v31, %v1854_v37 }
 0xb6f   : > { %v778_v33 = vsel %vm195_vm0, %v777_v32, 0.0 }
 0xb70   : > { %779 = vadd.xlane.f32.xlu0 %v778_v33 }
 0xbe3   : > { %v780_v34 = vpop.xlane.xlu0 %779 }
 0xbe4   : > { %v781_v35 = vmul.f32 %v780_v34, %v1832_v5 }
 0xbe6   : > { %v782_v36 = vsub.f32 %v777_v32, %v781_v35 }
 0xbe8   : > { %v783_v39 = vmul.f32 %v782_v36, %v782_v36 }
 0xbea   : > { %v784_v40 = vsel %vm195_vm0, %v783_v39, 0.0 }
 0xbeb   : > { %785 = vadd.xlane.f32.xlu1 %v784_v40 }
 0xc5e   : > { %v786_v3 = vpop.xlane.xlu1 %785 }
 0xc5f   : > { %v787_v43 = vmul.f32 %v786_v3, %v1832_v5 }
 0xc61   : > { %v788_v44 = vadd.f32 1e-12, %v787_v43 }
 0xc63   : > { %1517 = vrsqrt.f32 %v788_v44  ;;  %vm795_vm4 = vweird.f32 %v788_v44 }
 0xc69   : > { %v1518_v37 = vpop.eup %1517 }
 0xc6a   : > { %v790_v45 = vmul.f32 %v1518_v37, %v788_v44  ;;  %vm796_vm3 = vweird.f32 %v1518_v37 }
 0xc6b   : > { %vm797_vm6 = vmor %vm795_vm4, %vm796_vm3 }
 0xc6c   : > { %v791_v46 = vmul.f32 %v1518_v37, %v790_v45 }
 0xc6e   : > { %v792_v47 = vmul.f32 0.5, %v791_v46 }
 0xc70   : > { %v793_v48 = vsub.f32 1.5, %v792_v47 }
 0xc72   : > { %v794_v49 = vmul.f32 %v1518_v37, %v793_v48 }
 0xc74   : > { %v798_v51 = vsel %vm797_vm6, %v1518_v37, %v794_v49 }
 0xc75   : > { %v799_v52 = vmul.f32 %v798_v51, %v782_v36  ;;  %v919_v51 = vld [vmem:[#allocation5 + $0xf0] sm:$0xff] }
 0xc77   : > { %v801_v54 = vmul.f32 %v800_v50, %v799_v52  ;;  %v920_v50 = vld [vmem:[#allocation5 + $0xf8] sm:$0xff] }
 0xc78   : > { %952 = vmatpush.msrb.mxu0 %v920_v50 }
 0xc79   : > { %v1887_v55 = vadd.f32 %v802_v53, %v801_v54 }
 0xc7a   : > { %953 = vmatpush.msrb.mxu0 %v919_v51 }
 0xc7b   : > { %1408 = vmatmul.msk.f32.vlgmr.msra.gmra.mxu3 %vm195_vm0, %v1887_v55 }
 0xcfe   : > { %v825_v57 = vpop.f32.mrf.mxu3 }
 0xcff   : > { %v826_v58 = vadd.f32 %v825_v57, %v804_v56 }
 0xd01   : > { %v829_v59 = vmul.f32 0.70710677, %v826_v58  ;;  %v828_v39 = vmul.f32 0.5, %v826_v58 }
 0xd03   : > { %v832_v60 = vand.u32 2147483647, %v829_v59  ;;  %vm830_vm11 = vcmp.lt.f32.partialorder %v829_v59, 0.0 }
 0xd04   : > { %v831_v35 = vsel %vm830_vm11, -1.0, %v1683_v6 }
 0xd05   : > { %v833_v61 = vmul.f32 0.3275911, %v832_v60  ;;  %v858_v20 = vsub.f32 0.0, %v832_v60 }
 0xd07   : > { %v834_v62 = vadd.f32 1.0, %v833_v61  ;;  %v859_v23 = vmul.f32 %v858_v20, %v832_v60  ;;  %v914_v61 = vperm.slane %v1858_v38, 6 }
 0xd09   : > { %1519 = vrcp.f32 %v834_v62  ;;  %v846_v11 = vand.u32 2147483648, %v834_v62  ;;  %v844_v14 = vand.u32 2147483647, %v834_v62  ;;  %vm840_vm8 = vweird.f32 %v834_v62 }
 0xd0a   : > { %v860_v26 = vmul.f32 1.442695, %v859_v23 }
 0xd0b   : > { %v847_v17 = vor.u32 1.1754944e-38, %v846_v11  ;;  %vm845_vm10 = vcmp.eq.f32.partialorder %v844_v14, 8.507059e+37 }
 0xd0c   : > { %1521 = vpow2.f32 %v860_v26 }
 0xd0f   : > { %v1520_v7 = vpop.eup %1519 }
 0xd10   : > { %v836_v9 = vmul.f32 %v1520_v7, %v834_v62  ;;  %vm841_vm7 = vweird.f32 %v1520_v7 }
 0xd11   : > { %vm842_vm9 = vmor %vm840_vm8, %vm841_vm7 }
 0xd12   : > { %v837_v10 = vsub.f32 1.0, %v836_v9  ;;  %v1522_v32 = vpop.eup %1521 }
 0xd14   : > { %v838_v13 = vmul.f32 %v1520_v7, %v837_v10 }
 0xd16   : > { %v839_v16 = vadd.f32 %v1520_v7, %v838_v13 }
 0xd18   : > { %v843_v18 = vsel %vm842_vm9, %v1520_v7, %v839_v16  ;;  %v1906_v7 = vld [vmem:[#allocation5 + $0x160] sm:$0xff] }
 0xd19   : > { %v848_v19 = vsel %vm845_vm10, %v847_v17, %v843_v18  ;;  %v934_v8 = vperm.slane %v1906_v7, 0 }
 0xd1a   : > { %v849_v21 = vmul.f32 1.0614054, %v848_v19 }
 0xd1c   : > { %v850_v22 = vadd.f32 -1.4531521, %v849_v21 }
 0xd1e   : > { %v851_v24 = vmul.f32 %v850_v22, %v848_v19 }
 0xd20   : > { %v852_v25 = vadd.f32 1.4214138, %v851_v24 }
 0xd22   : > { %v853_v27 = vmul.f32 %v852_v25, %v848_v19 }
 0xd24   : > { %v854_v28 = vadd.f32 -0.28449672, %v853_v27 }
 0xd26   : > { %v855_v29 = vmul.f32 %v854_v28, %v848_v19 }
 0xd28   : > { %v856_v30 = vadd.f32 0.2548296, %v855_v29 }
 0xd2a   : > { %v857_v31 = vmul.f32 %v856_v30, %v848_v19 }
 0xd2c   : > { %v862_v33 = vmul.f32 %v1522_v32, %v857_v31 }
 0xd2e   : > { %v863_v34 = vsub.f32 1.0, %v862_v33 }
 0xd30   : > { %v864_v36 = vmul.f32 %v863_v34, %v831_v35 }
 0xd32   : > { %v865_v40 = vadd.f32 1.0, %v864_v36 }
 0xd34   : > { %v866_v41 = vmul.f32 %v865_v40, %v828_v39 }
 0xd36   : > { %1409 = vmatmul.msk.f32.vlgmr.msra.gmra.mxu2 %vm502_vm5, %v866_v41 }
 0xdb9   : > { %v888_v3 = vpop.f32.mrf.mxu2 }
 0xdba   : > { %v889_v43 = vadd.f32 %v888_v3, %v867_v42 }
 0xdbc   : > { %v891_v44 = vadd.f32 %v889_v43, %v1887_v55 }
 0xdbe   : > { %v892_v37 = vsel %vm195_vm0, %v891_v44, 0.0 }
 0xdbf   : > { %893 = vadd.xlane.f32.xlu2 %v892_v37 }
 0xe32   : > { %v894_v45 = vpop.xlane.xlu2 %893 }
 0xe33   : > { %v895_v46 = vmul.f32 %v894_v45, %v1832_v5 }
 0xe35   : > { %v896_v47 = vsub.f32 %v891_v44, %v895_v46 }
 0xe37   : > { %v897_v48 = vmul.f32 %v896_v47, %v896_v47 }
 0xe39   : > { %v898_v49 = vsel %vm195_vm0, %v897_v48, 0.0 }
 0xe3a   : > { %899 = vadd.xlane.f32.xlu2 %v898_v49 }
 0xead   : > { %v900_v52 = vpop.xlane.xlu2 %899 }
 0xeae   : > { %v901_v53 = vmul.f32 %v900_v52, %v1832_v5  ;;  %v922_v52 = vld [vmem:[#allocation5 + $0x108] sm:$0xff] }
 0xeb0   : > { %v902_v54 = vadd.f32 1e-12, %v901_v53 }
 0xeb2   : > { %1523 = vrsqrt.f32 %v902_v54  ;;  %vm909_vm13 = vweird.f32 %v902_v54 }
 0xeb8   : > { %v1524_v55 = vpop.eup %1523 }
 0xeb9   : > { %v904_v56 = vmul.f32 %v1524_v55, %v902_v54  ;;  %vm910_vm12 = vweird.f32 %v1524_v55  ;;  %v921_v54 = vld [vmem:[#allocation5 + $0x100] sm:$0xff] }
 0xeba   : > { %vm911_vm14 = vmor %vm909_vm13, %vm910_vm12 }
 0xebb   : > { %v905_v57 = vmul.f32 %v1524_v55, %v904_v56 }
 0xebd   : > { %v906_v58 = vmul.f32 0.5, %v905_v57 }
 0xebf   : > { %v907_v59 = vsub.f32 1.5, %v906_v58  ;;  %v1118_v58 = vperm.slane %v1906_v7, 1 }
 0xec1   : > { %v908_v60 = vmul.f32 %v1524_v55, %v907_v59 }
 0xec3   : > { %v912_v62 = vsel %vm911_vm14, %v1524_v55, %v908_v60 }
 0xec4   : > { %v913_v63 = vmul.f32 %v912_v62, %v896_v47 }
 0xec6   : > { %v915_v1 = vmul.f32 %v914_v61, %v913_v63 }
 0xec8   : > { %v1902_v4 = vadd.f32 %v916_v0, %v915_v1 }
 0xeca   : > { %1410 = vmatmul.msk.f32.vlgmr.msrb.gmra.mxu0 %vm195_vm0, %v1902_v4 }
 0xf47   : > { %v955_v9 = vpop.f32.mrf.mxu0 }
 0xf48   : > { %v956_v2 = vadd.f32 %v955_v9, %v934_v8 }
 0xf4a   : > { %959 = vrot.lane.b32.xlu1 %v956_v2, %s1677_s27  ;;  %1035 = vrot.lane.b32.xlu0 %v956_v2, %s1676_s17 }
 0xf4b   : > { %1037 = vrot.lane.b32.xlu2 %v956_v2, %s1678_s7 }
 0xfa5   : > { %v1038_v10 = vpop.permute.xlu2 %1037 }
 0xfa6   : > { %1414 = vmatpush.xpose.msk.msra.mxu0 %vm222_vm1, %v1038_v10  ;;  %v923_v10 = vld [vmem:[#allocation5 + $0x110] sm:$0xff] }
 0xfbc   : > { %v960_v38 = vpop.permute.xlu1 %959  ;;  %v1036_v11 = vpop.permute.xlu0 %1035 }
 0xfbd   : > { %1411 = vmatpush.xpose.msk.msrb.mxu1 %vm222_vm1, %v960_v38  ;;  %1415 = vmatmul.msk.f32.vlgmr.msra.gmra.mxu0 %vm222_vm1, %v1036_v11 }
 0xfc0   : > { %1412 = vmatmul.msk.f32.vlgmr.msrb.gmra.mxu1 %vm222_vm1, %v956_v2 }
0x103a   : > { %v1060_v12 = vpop.f32.mrf.mxu0 }
0x103b   : > { %v1063_v13 = vsel %vm222_vm1, %v1060_v12, -inf }
0x103c   : > { %1064 = vmax.xlane.f32.xlu2 %v1063_v13 }
0x103d   : > { %v982_v14 = vpop.f32.mrf.mxu1 }
0x103e   : > { %v985_v15 = vsel %vm222_vm1, %v982_v14, -inf }
0x103f   : > { %986 = vmax.xlane.f32.xlu0 %v985_v15 }
0x1054   : > { %1087 = vrot.lane.b32.xlu2 %v956_v2, %s1680_s13 }
0x10af   : > { %v1065_v16 = vpop.xlane.xlu2 %1064 }
0x10b0   : > { %v1066_v17 = vsub.f32 %v1060_v12, %v1065_v16 }
0x10b2   : > { %v1067_v18 = vmul.f32 1.442695, %v1066_v17  ;;  %v987_v19 = vpop.xlane.xlu0 %986 }
0x10b3   : > { %v988_v20 = vsub.f32 %v982_v14, %v987_v19 }
0x10b4   : > { %1525 = vpow2.f32 %v1067_v18  ;;  %v1165_v18 = vperm.slane %v1906_v7, 2 }
0x10b5   : > { %v989_v21 = vmul.f32 1.442695, %v988_v20 }
0x10b7   : > { %1527 = vpow2.f32 %v989_v21  ;;  %v1088_v22 = vpop.permute.xlu2 %1087  ;;  %v1167_v21 = vperm.slane %v1906_v7, 3 }
0x10b8   : > { %1108 = vmatpush.msra.mxu1 %v1088_v22 }
0x10ba   : > { %v1526_v23 = vpop.eup %1525 }
0x10bb   : > { %v1069_v24 = vsel %vm222_vm1, %v1526_v23, 0.0 }
0x10bc   : > { %1070 = vadd.xlane.f32.xlu1 %v1069_v24  ;;  %v1169_v24 = vperm.slane %v1906_v7, 4 }
0x10bd   : > { %v1528_v25 = vpop.eup %1527 }
0x10be   : > { %v991_v26 = vsel %vm222_vm1, %v1528_v25, 0.0 }
0x10bf   : > { %992 = vadd.xlane.f32.xlu0 %v991_v26 }
0x10d5   : > { %1009 = vrot.lane.b32.xlu1 %v956_v2, %s1679_s8  ;;  %v924_v2 = vld [vmem:[#allocation5 + $0x118] sm:$0xff] }
0x10d6   : > { %1187 = vmatpush.msrb.mxu2 %v924_v2 }
0x10d8   : > { %1188 = vmatpush.msrb.mxu2 %v923_v10  ;;  %v1232_v10 = vperm.slane %v1906_v7, 5 }
0x112f   : > { %v1071_v27 = vpop.xlane.xlu1 %1070 }
0x1130   : > { %1529 = vrcp.f32 %v1071_v27  ;;  %v1083_v33 = vand.u32 2147483648, %v1071_v27  ;;  %v1081_v36 = vand.u32 2147483647, %v1071_v27  ;;  %vm1077_vm2 = vweird.f32 %v1071_v27 }
0x1132   : > { %v993_v28 = vpop.xlane.xlu0 %992  ;;  %v1084_v41 = vor.u32 1.1754944e-38, %v1083_v33  ;;  %vm1082_vm6 = vcmp.eq.f32.partialorder %v1081_v36, 8.507059e+37  ;;  %v930_v33 = vld [vmem:[#allocation5 + $0x148] sm:$0xff]  ;;  %v928_v36 = vld [vmem:[#allocation5 + $0x138] sm:$0xff] }
0x1133   : > { %1531 = vrcp.f32 %v993_v28  ;;  %v1005_v3 = vand.u32 2147483648, %v993_v28  ;;  %v1003_v44 = vand.u32 2147483647, %v993_v28  ;;  %vm999_vm7 = vweird.f32 %v993_v28 }
0x1135   : > { %v1006_v48 = vor.u32 1.1754944e-38, %v1005_v3  ;;  %vm1004_vm9 = vcmp.eq.f32.partialorder %v1003_v44, 8.507059e+37  ;;  %v926_v3 = vld [vmem:[#allocation5 + $0x128] sm:$0xff] }
0x1136   : > { %v1530_v29 = vpop.eup %1529 }
0x1137   : > { %v1073_v30 = vmul.f32 %v1530_v29, %v1071_v27  ;;  %vm1078_vm15 = vweird.f32 %v1530_v29 }
0x1138   : > { %vm1079_vm3 = vmor %vm1077_vm2, %vm1078_vm15 }
0x1139   : > { %v1532_v31 = vpop.eup %1531  ;;  %v1074_v32 = vsub.f32 1.0, %v1073_v30 }
0x113a   : > { %v995_v34 = vmul.f32 %v1532_v31, %v993_v28  ;;  %vm1000_vm4 = vweird.f32 %v1532_v31 }
0x113b   : > { %v1075_v35 = vmul.f32 %v1530_v29, %v1074_v32  ;;  %vm1001_vm8 = vmor %vm999_vm7, %vm1000_vm4  ;;  %v931_v32 = vld [vmem:[#allocation5 + $0x150] sm:$0xff] }
0x113c   : > { %v996_v39 = vsub.f32 1.0, %v995_v34  ;;  %v929_v34 = vld [vmem:[#allocation5 + $0x140] sm:$0xff] }
0x113d   : > { %v1076_v40 = vadd.f32 %v1530_v29, %v1075_v35 }
0x113e   : > { %v997_v42 = vmul.f32 %v1532_v31, %v996_v39 }
0x113f   : > { %v1080_v43 = vsel %vm1079_vm3, %v1530_v29, %v1076_v40  ;;  %v927_v40 = vld [vmem:[#allocation5 + $0x130] sm:$0xff] }
0x1140   : > { %v1085_v37 = vsel %vm1082_vm6, %v1084_v41, %v1080_v43  ;;  %v998_v45 = vadd.f32 %v1532_v31, %v997_v42 }
0x1141   : > { %v1086_v46 = vmul.f32 %v1526_v23, %v1085_v37  ;;  %v925_v37 = vld [vmem:[#allocation5 + $0x120] sm:$0xff] }
0x1142   : > { %v1002_v47 = vsel %vm1001_vm8, %v1532_v31, %v998_v45  ;;  %v932_v31 = vld [vmem:[#allocation5 + $0x158] sm:$0xff] }
0x1143   : > { %1416 = vmatmul.msk.f32.vlgmr.msra.gmra.mxu1 %vm222_vm1, %v1086_v46  ;;  %v1007_v49 = vsel %vm1004_vm9, %v1006_v48, %v1002_v47  ;;  %1244 = vmatpush.msrb.mxu0 %v932_v31 }
0x1144   : > { %v1008_v51 = vmul.f32 %v1528_v25, %v1007_v49 }
0x1145   : > { %1245 = vmatpush.msrb.mxu0 %v931_v32 }
0x1147   : > { %v1010_v50 = vpop.permute.xlu1 %1009  ;;  %1246 = vmatpush.msrb.mxu0 %v930_v33 }
0x1148   : > { %1030 = vmatpush.msrb.mxu3 %v1010_v50 }
0x1149   : > { %1413 = vmatmul.msk.f32.vlgmr.msrb.gmra.mxu3 %vm222_vm1, %v1008_v51  ;;  %1247 = vmatpush.msrb.mxu0 %v929_v34 }
0x114a   : > { %1136 = vmatpush.msra.mxu3 %v922_v52 }
0x114b   : > { %1248 = vmatpush.msrb.mxu0 %v928_v36 }
0x114c   : > { %1137 = vmatpush.msra.mxu3 %v921_v54 }
0x114d   : > { %1249 = vmatpush.msrb.mxu0 %v927_v40 }
0x114f   : > { %1250 = vmatpush.msrb.mxu0 %v926_v3 }
0x1151   : > { %1251 = vmatpush.msrb.mxu0 %v925_v37 }
0x11c0   : > { %v1110_v53 = vpop.f32.mrf.mxu1 }
0x11c1   : > { %1114 = vrot.lane.b32.xlu0 %v1110_v53, %s1681_s14 }
0x11cc   : > { %v1032_v55 = vpop.f32.mrf.mxu3 }
0x1233   : > { %v1115_v56 = vpop.permute.xlu0 %1114 }
0x1234   : > { %v1117_v57 = vsel %vm222_vm1, %v1032_v55, %v1115_v56 }
0x1235   : > { %1417 = vmatmul.msk.f32.vlgmr.msra.gmra.mxu3 %vm195_vm0, %v1117_v57 }
0x12b8   : > { %v1139_v59 = vpop.f32.mrf.mxu3 }
0x12b9   : > { %v1140_v60 = vadd.f32 %v1139_v59, %v1118_v58 }
0x12bb   : > { %v1142_v61 = vadd.f32 %v1140_v60, %v1902_v4 }
0x12bd   : > { %v1143_v62 = vsel %vm195_vm0, %v1142_v61, 0.0 }
0x12be   : > { %1144 = vadd.xlane.f32.xlu2 %v1143_v62 }
0x1331   : > { %v1145_v63 = vpop.xlane.xlu2 %1144 }
0x1332   : > { %v1146_v0 = vmul.f32 %v1145_v63, %v1832_v5 }
0x1334   : > { %v1147_v1 = vsub.f32 %v1142_v61, %v1146_v0 }
0x1336   : > { %v1148_v8 = vmul.f32 %v1147_v1, %v1147_v1 }
0x1338   : > { %v1149_v9 = vsel %vm195_vm0, %v1148_v8, 0.0 }
0x1339   : > { %1150 = vadd.xlane.f32.xlu0 %v1149_v9 }
0x13ac   : > { %v1151_v38 = vpop.xlane.xlu0 %1150 }
0x13ad   : > { %v1152_v11 = vmul.f32 %v1151_v38, %v1832_v5 }
0x13af   : > { %v1153_v12 = vadd.f32 1e-12, %v1152_v11 }
0x13b1   : > { %1533 = vrsqrt.f32 %v1153_v12  ;;  %vm1160_vm10 = vweird.f32 %v1153_v12 }
0x13b7   : > { %v1534_v4 = vpop.eup %1533 }
0x13b8   : > { %v1155_v13 = vmul.f32 %v1534_v4, %v1153_v12  ;;  %vm1161_vm1 = vweird.f32 %v1534_v4 }
0x13b9   : > { %vm1162_vm11 = vmor %vm1160_vm10, %vm1161_vm1 }
0x13ba   : > { %v1156_v14 = vmul.f32 %v1534_v4, %v1155_v13 }
0x13bc   : > { %v1157_v15 = vmul.f32 0.5, %v1156_v14 }
0x13be   : > { %v1158_v16 = vsub.f32 1.5, %v1157_v15 }
0x13c0   : > { %v1159_v17 = vmul.f32 %v1534_v4, %v1158_v16 }
0x13c2   : > { %v1163_v19 = vsel %vm1162_vm11, %v1534_v4, %v1159_v17 }
0x13c3   : > { %v1164_v20 = vmul.f32 %v1163_v19, %v1147_v1 }
0x13c5   : > { %v1166_v22 = vmul.f32 %v1165_v18, %v1164_v20 }
0x13c7   : > { %v1935_v23 = vadd.f32 %v1167_v21, %v1166_v22 }
0x13c9   : > { %1418 = vmatmul.msk.f32.vlgmr.msrb.gmra.mxu2 %vm195_vm0, %v1935_v23 }
0x144c   : > { %v1190_v25 = vpop.f32.mrf.mxu2 }
0x144d   : > { %v1191_v26 = vadd.f32 %v1190_v25, %v1169_v24 }
0x144f   : > { %v1194_v27 = vmul.f32 0.70710677, %v1191_v26  ;;  %v1193_v8 = vmul.f32 0.5, %v1191_v26  ;;  %v1279_v26 = vperm.slane %v1906_v7, 6 }
0x1451   : > { %v1197_v28 = vand.u32 2147483647, %v1194_v27  ;;  %vm1195_vm2 = vcmp.lt.f32.partialorder %v1194_v27, 0.0 }
0x1452   : > { %v1196_v0 = vsel %vm1195_vm2, -1.0, %v1683_v6 }
0x1453   : > { %v1198_v29 = vmul.f32 0.3275911, %v1197_v28  ;;  %v1223_v49 = vsub.f32 0.0, %v1197_v28 }
0x1455   : > { %v1199_v30 = vadd.f32 1.0, %v1198_v29  ;;  %v1224_v52 = vmul.f32 %v1223_v49, %v1197_v28  ;;  %v1281_v28 = vperm.slane %v1906_v7, 7 }
0x1457   : > { %1535 = vrcp.f32 %v1199_v30  ;;  %v1211_v42 = vand.u32 2147483648, %v1199_v30  ;;  %v1209_v44 = vand.u32 2147483647, %v1199_v30  ;;  %vm1205_vm13 = vweird.f32 %v1199_v30 }
0x1458   : > { %v1225_v55 = vmul.f32 1.442695, %v1224_v52 }
0x1459   : > { %v1212_v46 = vor.u32 1.1754944e-38, %v1211_v42  ;;  %vm1210_vm15 = vcmp.eq.f32.partialorder %v1209_v44, 8.507059e+37 }
0x145a   : > { %1537 = vpow2.f32 %v1225_v55 }
0x145d   : > { %v1536_v35 = vpop.eup %1535 }
0x145e   : > { %v1201_v39 = vmul.f32 %v1536_v35, %v1199_v30  ;;  %vm1206_vm12 = vweird.f32 %v1536_v35 }
0x145f   : > { %vm1207_vm14 = vmor %vm1205_vm13, %vm1206_vm12 }
0x1460   : > { %v1202_v41 = vsub.f32 1.0, %v1201_v39  ;;  %v1538_v61 = vpop.eup %1537 }
0x1462   : > { %v1203_v43 = vmul.f32 %v1536_v35, %v1202_v41 }
0x1464   : > { %v1204_v45 = vadd.f32 %v1536_v35, %v1203_v43 }
0x1466   : > { %v1208_v47 = vsel %vm1207_vm14, %v1536_v35, %v1204_v45 }
0x1467   : > { %v1213_v48 = vsel %vm1210_vm15, %v1212_v46, %v1208_v47 }
0x1468   : > { %v1214_v50 = vmul.f32 1.0614054, %v1213_v48 }
0x146a   : > { %v1215_v51 = vadd.f32 -1.4531521, %v1214_v50 }
0x146c   : > { %v1216_v53 = vmul.f32 %v1215_v51, %v1213_v48 }
0x146e   : > { %v1217_v54 = vadd.f32 1.4214138, %v1216_v53 }
0x1470   : > { %v1218_v56 = vmul.f32 %v1217_v54, %v1213_v48 }
0x1472   : > { %v1219_v57 = vadd.f32 -0.28449672, %v1218_v56 }
0x1474   : > { %v1220_v58 = vmul.f32 %v1219_v57, %v1213_v48 }
0x1476   : > { %v1221_v59 = vadd.f32 0.2548296, %v1220_v58 }
0x1478   : > { %v1222_v60 = vmul.f32 %v1221_v59, %v1213_v48 }
0x147a   : > { %v1227_v62 = vmul.f32 %v1538_v61, %v1222_v60 }
0x147c   : > { %v1228_v63 = vsub.f32 1.0, %v1227_v62 }
0x147e   : > { %v1229_v1 = vmul.f32 %v1228_v63, %v1196_v0 }
0x1480   : > { %v1230_v9 = vadd.f32 1.0, %v1229_v1 }
0x1482   : > { %v1231_v2 = vmul.f32 %v1230_v9, %v1193_v8 }
0x1484   : > { %1419 = vmatmul.msk.f32.vlgmr.msrb.gmra.mxu0 %vm502_vm5, %v1231_v2 }
0x1501   : > { %v1253_v38 = vpop.f32.mrf.mxu0 }
0x1502   : > { %v1254_v11 = vadd.f32 %v1253_v38, %v1232_v10 }
0x1504   : > { %v1256_v12 = vadd.f32 %v1254_v11, %v1935_v23 }
0x1506   : > { %v1257_v4 = vsel %vm195_vm0, %v1256_v12, 0.0 }
0x1507   : > { %1258 = vadd.xlane.f32.xlu1 %v1257_v4 }
0x157a   : > { %v1259_v13 = vpop.xlane.xlu1 %1258 }
0x157b   : > { %v1260_v14 = vmul.f32 %v1259_v13, %v1832_v5 }
0x157d   : > { %v1261_v6 = vsub.f32 %v1256_v12, %v1260_v14 }
0x157f   : > { %v1262_v15 = vmul.f32 %v1261_v6, %v1261_v6 }
0x1581   : > { %v1263_v16 = vsel %vm195_vm0, %v1262_v15, 0.0 }
0x1582   : > { %1264 = vadd.xlane.f32.xlu2 %v1263_v16 }
0x15f5   : > { %v1265_v17 = vpop.xlane.xlu2 %1264 }
0x15f6   : > { %v1266_v18 = vmul.f32 %v1265_v17, %v1832_v5 }
0x15f8   : > { %v1267_v19 = vadd.f32 1e-12, %v1266_v18 }
0x15fa   : > { %1539 = vrsqrt.f32 %v1267_v19  ;;  %vm1274_vm3 = vweird.f32 %v1267_v19 }
0x1600   : > { %v1540_v20 = vpop.eup %1539 }
0x1601   : > { %v1269_v21 = vmul.f32 %v1540_v20, %v1267_v19  ;;  %vm1275_vm5 = vweird.f32 %v1540_v20 }
0x1602   : > { %vm1276_vm4 = vmor %vm1274_vm3, %vm1275_vm5 }
0x1603   : > { %v1270_v22 = vmul.f32 %v1540_v20, %v1269_v21 }
0x1605   : > { %v1271_v23 = vmul.f32 0.5, %v1270_v22 }
0x1607   : > { %v1272_v24 = vsub.f32 1.5, %v1271_v23 }
0x1609   : > { %v1273_v25 = vmul.f32 %v1540_v20, %v1272_v24 }
0x160b   : > { %v1277_v5 = vsel %vm1276_vm4, %v1540_v20, %v1273_v25 }
0x160c   : > { %v1278_v27 = vmul.f32 %v1277_v5, %v1261_v6 }
0x160e   : > { %v1280_v29 = vmul.f32 %v1279_v26, %v1278_v27 }
0x1610   : > { %v1282_v30 = vadd.f32 %v1281_v28, %v1280_v29 }
0x1612   : > { %1283 = vst.msk [vmem:[%s177_s21] sm:$0xff] %vm195_vm0, %v1282_v30 }
0x1613   : > { %1628 = shalt.err (!%p1625_p9)
}
0x1614   : > { %1430 = dma.vmem_to_hbm [thread:$0]  (%p1759_p13), %s1298_s22, 128, %s1300_s24, %s1285_s16  }
0x1615 PF: > { %s1311_s29 = sand.u32 1, %s1659_s9   ;;  %p1994_p10 = scmp.ge.s32.totalorder %s1671_s12, 2 }
0x1616   : > { %s1312_s7 = scalar_lea.sflag [#allocation4], %s1311_s29 }
0x1617   : > { %p1441_p11 = pnand %p1994_p10, %p1764_p4 }
0x1619   : > { %p1442_p0 = pneg %p1441_p11 }
0x161b   : > { %1654 = dma.done.wait (%p1442_p0), %s1312_s7, 128  }
0x161c   : > { %1656 = vsyncadd (%p1442_p0), %s1312_s7, 4294967168  ;;  %p16_p2 = scmp.ge.s32.totalorder %s1739_s23, 4   ;;  %s1995_s9 = smov %s1663_s10 }
0x161d   : > { %s1996_s10 = smov %s1667_s11  ;;  %s1997_s11 = smov %s1751_s26 }
0x161e   : > { %s1998_s12 = smov %s1739_s23  ;;  %18 = sbr.rel (!%p16_p2) target bundleno = 6 (0x6), region = 79 }
0x1623   :  { %1318 = vsyncpa [#allocation3], 1 }
0x1624   :  { %1320 = vsyncpa [#allocation3 + $0x1], 1 }
0x1625   :  { %1321 = vsyncpa [#allocation6], 1 }
0x1626   :  { %1322 = vsyncpa [#allocation4], 1 }
0x1627   :  { %1324 = vsyncpa [#allocation4 + $0x1], 1 }

</bundles_post_ra>
